<compile_context>
chip_gen: v7x
topology: tpu7x:2x2x1
jax: 0.10.0
libtpu: 0.0.40
codegen_flags: <defaults>
</compile_context>

<pallas_src>
import functools

import jax
import jax.numpy as jnp
from jax.experimental import pallas as pl
from jax.experimental.pallas import tpu as pltpu

LANE = 128      # lane width: pad feature dims to multiples of this
TILE_M = 128    # batch-tile rows per grid step (fills MXU LHS rows)


def _pad_axis(a, axis, target):
    pad = target - a.shape[axis]
    if pad <= 0:
        return a
    widths = [(0, 0)] * a.ndim
    widths[axis] = (0, pad)
    return jnp.pad(a, widths)


# ----------------------------------------------------------------------------
# Kernel: one batch tile of the full forward pass.
# ----------------------------------------------------------------------------
def dnn_nn2_kernel(
    x_ref,
    W1_ref, b1_ref, W2_ref, b2_ref, W3_ref, b3_ref,      # stacked NN2 blocks
    anb_ref, anscale_ref,                                 # stacked actnorm params
    Wf1_ref, bf1_ref, Wf2_ref, bf2_ref, Wf3_ref, bf3_ref,  # final NN2
    out_ref,
    *, depth,
):
    bf16 = jnp.bfloat16
    x = x_ref[...]                               # (TILE_M, Dp) fp32

    # depth is small & static -> Python-unrolled.
    # TODO(synk): if depth grows beyond ~4, move depth onto an "arbitrary" grid
    # axis with per-depth weight BlockSpecs and a VMEM accumulator for x.
    for i in range(depth):
        h = jnp.dot(x.astype(bf16), W1_ref[i],
                    preferred_element_type=jnp.float32) + b1_ref[i]
        h = jnp.maximum(h, 0.0)
        h = jnp.dot(h.astype(bf16), W2_ref[i],
                    preferred_element_type=jnp.float32) + b2_ref[i]
        h = jnp.maximum(h, 0.0)
        r = jnp.dot(h.astype(bf16), W3_ref[i],
                    preferred_element_type=jnp.float32) + b3_ref[i]
        x = x + r                                # residual
        x = (x + anb_ref[i]) * anscale_ref[i]    # actnorm: (x + b) * exp(logs)
        x = jnp.maximum(x, 0.0)                  # relu

    # final NN2: input_dim -> width -> width -> n_out
    h = jnp.dot(x.astype(bf16), Wf1_ref[...],
                preferred_element_type=jnp.float32) + bf1_ref[...]
    h = jnp.maximum(h, 0.0)
    h = jnp.dot(h.astype(bf16), Wf2_ref[...],
                preferred_element_type=jnp.float32) + bf2_ref[...]
    h = jnp.maximum(h, 0.0)
    out_ref[...] = (
        jnp.dot(h.astype(bf16), Wf3_ref[...],
                preferred_element_type=jnp.float32) + bf3_ref[...]
    )


# ----------------------------------------------------------------------------
# Wrapper: lane-dense padding, bf16 weight cast, batch-tiled pallas_call.
# ----------------------------------------------------------------------------
def dnn_nn2_forward(x, params, depth, *, tile_m=TILE_M):
    B, D = x.shape
    n_out = params["Wf3"].shape[-1]
    assert params["W1"].shape[-1] == D, "residual requires width == input_dim"

    Dp = pl.cdiv(D, LANE) * LANE
    Np = pl.cdiv(n_out, LANE) * LANE
    bf16 = jnp.bfloat16

    def pad2(a, rows, cols):                       # pad last two dims
        return _pad_axis(_pad_axis(a, -1, cols), -2, rows)

    # --- lane-dense, zero-padded parameters (zero pad => identical math) ---
    W1 = pad2(params["W1"], Dp, Dp).astype(bf16)
    W2 = pad2(params["W2"], Dp, Dp).astype(bf16)
    W3 = pad2(params["W3"], Dp, Dp).astype(bf16)
    b1 = _pad_axis(params["b1"], -1, Dp)
    b2 = _pad_axis(params["b2"], -1, Dp)
    b3 = _pad_axis(params["b3"], -1, Dp)
    an_b = _pad_axis(params["an_b"], -1, Dp)
    an_scale = _pad_axis(jnp.exp(params["an_logs"]), -1, Dp)   # hoisted exp
    Wf1 = pad2(params["Wf1"], Dp, Dp).astype(bf16)
    Wf2 = pad2(params["Wf2"], Dp, Dp).astype(bf16)
    Wf3 = pad2(params["Wf3"], Dp, Np).astype(bf16)
    bf1 = _pad_axis(params["bf1"], -1, Dp)
    bf2 = _pad_axis(params["bf2"], -1, Dp)
    bf3 = _pad_axis(params["bf3"], -1, Np)

    weight_args = (W1, b1, W2, b2, W3, b3, an_b, an_scale,
                   Wf1, bf1, Wf2, bf2, Wf3, bf3)

    # --- batch padding / tiling ---
    n_tiles = pl.cdiv(B, tile_m)
    Bp = n_tiles * tile_m
    xp = _pad_axis(_pad_axis(x.astype(jnp.float32), -1, Dp), 0, Bp)

    def rep(a):  # replicated (same whole-array block for every batch tile)
        return pl.BlockSpec(a.shape, lambda i, _nd=a.ndim: (0,) * _nd)

    in_specs = ([pl.BlockSpec((tile_m, Dp), lambda i: (i, 0))]
                + [rep(a) for a in weight_args])
    out_specs = pl.BlockSpec((tile_m, Np), lambda i: (i, 0))

    # explicit VMEM budget: double-buffered x/out tiles + (2x) resident weights
    # + headroom; clamped to a value safe on every generation (v7x: 64 MiB phys).
    tile_bytes = (tile_m * Dp + tile_m * Np) * 4
    weight_bytes = sum(a.size * a.dtype.itemsize for a in weight_args)
    vmem_budget = 2 * tile_bytes + 2 * weight_bytes + (2 << 20)
    vmem_budget = max(16 << 20, min(vmem_budget, 32 << 20))

    out = pl.pallas_call(
        functools.partial(dnn_nn2_kernel, depth=depth),
        out_shape=jax.ShapeDtypeStruct((Bp, Np), jnp.float32),
        grid=(n_tiles,),
        in_specs=in_specs,
        out_specs=out_specs,
        compiler_params=pltpu.CompilerParams(
            dimension_semantics=("parallel",),
            vmem_limit_bytes=int(vmem_budget),
        ),
    )(xp, *weight_args)
    return out[:B, :n_out]


# ----------------------------------------------------------------------------
# References for verification.
# ----------------------------------------------------------------------------
def dnn_nn2_reference_bf16(x, params, depth):
    """Mirrors the kernel numerics exactly: bf16 matmul operands, fp32 acc."""
    bf16 = jnp.bfloat16

    def dot(a, w):
        return jnp.dot(a.astype(bf16), w.astype(bf16),
                       preferred_element_type=jnp.float32)

    for i in range(depth):
        h = jnp.maximum(dot(x, params["W1"][i]) + params["b1"][i], 0.0)
        h = jnp.maximum(dot(h, params["W2"][i]) + params["b2"][i], 0.0)
        r = dot(h, params["W3"][i]) + params["b3"][i]
        x = x + r
        x = (x + params["an_b"][i]) * jnp.exp(params["an_logs"][i])
        x = jnp.maximum(x, 0.0)
    h = jnp.maximum(dot(x, params["Wf1"]) + params["bf1"], 0.0)
    h = jnp.maximum(dot(h, params["Wf2"]) + params["bf2"], 0.0)
    return dot(h, params["Wf3"]) + params["bf3"]


def dnn_nn2_reference_fp32(x, params, depth):
    """Pure fp32 reference of the PyTorch module (loose sanity check)."""
    for i in range(depth):
        h = jnp.maximum(x @ params["W1"][i] + params["b1"][i], 0.0)
        h = jnp.maximum(h @ params["W2"][i] + params["b2"][i], 0.0)
        r = h @ params["W3"][i] + params["b3"][i]
        x = x + r
        x = (x + params["an_b"][i]) * jnp.exp(params["an_logs"][i])
        x = jnp.maximum(x, 0.0)
    h = jnp.maximum(x @ params["Wf1"] + params["bf1"], 0.0)
    h = jnp.maximum(h @ params["Wf2"] + params["bf2"], 0.0)
    return h @ params["Wf3"] + params["bf3"]


# ----------------------------------------------------------------------------
# Deterministic parameter construction (PyTorch-Linear-style uniform init).
# ----------------------------------------------------------------------------
def init_params(key, input_dim, depth, width, n_out):
    assert input_dim == width, "residual x + NN2(x) requires width == input_dim"

    def lin(k, fan_in, shape):
        bound = 1.0 / jnp.sqrt(jnp.float32(fan_in))
        return jax.random.uniform(k, shape, jnp.float32, -bound, bound)

    keys = jax.random.split(key, 16)
    return {
        "W1": lin(keys[0], input_dim, (depth, input_dim, width)),
        "b1": lin(keys[1], input_dim, (depth, 1, width)),
        "W2": lin(keys[2], width, (depth, width, width)),
        "b2": lin(keys[3], width, (depth, 1, width)),
        "W3": lin(keys[4], width, (depth, width, width)),
        "b3": lin(keys[5], width, (depth, 1, width)),
        "an_b": 0.1 * jax.random.normal(keys[6], (depth, 1, input_dim), jnp.float32),
        "an_logs": 0.1 * jax.random.normal(keys[7], (depth, 1, input_dim), jnp.float32),
        "Wf1": lin(keys[8], input_dim, (input_dim, width)),
        "bf1": lin(keys[9], input_dim, (1, width)),
        "Wf2": lin(keys[10], width, (width, width)),
        "bf2": lin(keys[11], width, (1, width)),
        "Wf3": lin(keys[12], width, (width, n_out)),
        "bf3": lin(keys[13], width, (1, n_out)),
    }


if __name__ == "__main__":
    # small shapes consistent with the module's forward (x is (batch, features));
    # batch is a non-multiple of TILE_M to exercise padding + multi-tile grid.
    batch = 200
    input_dim = 32
    width = 32          # must equal input_dim for the residual connection
    depth = 2
    n_out = 4

    key = jax.random.PRNGKey(0)
    k_x, k_p = jax.random.split(key)
    x = jax.random.normal(k_x, (batch, input_dim), jnp.float32)
    params = init_params(k_p, input_dim, depth, width, n_out)

    out = dnn_nn2_forward(x, params, depth)
    out = jax.block_until_ready(out)
    assert out.shape == (batch, n_out)

    # strict check vs. a reference with identical numerics (bf16 MXU, fp32 acc)
    ref_bf16 = dnn_nn2_reference_bf16(x, params, depth)
    assert jnp.allclose(out, ref_bf16, atol=1e-4, rtol=1e-4), "mismatch vs bf16 reference"

    # loose sanity check vs. the pure-fp32 module semantics
    ref_fp32 = dnn_nn2_reference_fp32(x, params, depth)
    assert jnp.allclose(out, ref_fp32, atol=0.1, rtol=0.1), "mismatch vs fp32 reference"

    print("KERNEL_OK")
</pallas_src>

<mosaic_0001>
module attributes {stable_mosaic.version = 11 : i64} {
  func.func @dnn_nn2_kernel(%arg0: i32, %arg1: memref<128x128xf32, #tpu.memory_space<vmem>>, %arg2: memref<2x128x128xbf16, #tpu.memory_space<vmem>>, %arg3: memref<2x1x128xf32, #tpu.memory_space<vmem>>, %arg4: memref<2x128x128xbf16, #tpu.memory_space<vmem>>, %arg5: memref<2x1x128xf32, #tpu.memory_space<vmem>>, %arg6: memref<2x128x128xbf16, #tpu.memory_space<vmem>>, %arg7: memref<2x1x128xf32, #tpu.memory_space<vmem>>, %arg8: memref<2x1x128xf32, #tpu.memory_space<vmem>>, %arg9: memref<2x1x128xf32, #tpu.memory_space<vmem>>, %arg10: memref<128x128xbf16, #tpu.memory_space<vmem>>, %arg11: memref<1x128xf32, #tpu.memory_space<vmem>>, %arg12: memref<128x128xbf16, #tpu.memory_space<vmem>>, %arg13: memref<1x128xf32, #tpu.memory_space<vmem>>, %arg14: memref<128x128xbf16, #tpu.memory_space<vmem>>, %arg15: memref<1x128xf32, #tpu.memory_space<vmem>>, %arg16: memref<128x128xf32, #tpu.memory_space<vmem>>) attributes {dimension_semantics = [#tpu.dimension_semantics<parallel>], iteration_bounds = array<i64: 2>, scalar_prefetch = 0 : i64, scratch_operands = 0 : i64, tpu.core_type = #tpu.core_type<tc>, window_params = [{transform_indices = @transform_0, window_bounds = array<i64: 128, 128>}, {pipeline_mode = #tpu.pipeline_mode<synchronous>, transform_indices = @transform_1, window_bounds = array<i64: 2, 128, 128>}, {pipeline_mode = #tpu.pipeline_mode<synchronous>, transform_indices = @transform_2, window_bounds = array<i64: 2, 1, 128>}, {pipeline_mode = #tpu.pipeline_mode<synchronous>, transform_indices = @transform_3, window_bounds = array<i64: 2, 128, 128>}, {pipeline_mode = #tpu.pipeline_mode<synchronous>, transform_indices = @transform_4, window_bounds = array<i64: 2, 1, 128>}, {pipeline_mode = #tpu.pipeline_mode<synchronous>, transform_indices = @transform_5, window_bounds = array<i64: 2, 128, 128>}, {pipeline_mode = #tpu.pipeline_mode<synchronous>, transform_indices = @transform_6, window_bounds = array<i64: 2, 1, 128>}, {pipeline_mode = #tpu.pipeline_mode<synchronous>, transform_indices = @transform_7, window_bounds = array<i64: 2, 1, 128>}, {pipeline_mode = #tpu.pipeline_mode<synchronous>, transform_indices = @transform_8, window_bounds = array<i64: 2, 1, 128>}, {pipeline_mode = #tpu.pipeline_mode<synchronous>, transform_indices = @transform_9, window_bounds = array<i64: 128, 128>}, {pipeline_mode = #tpu.pipeline_mode<synchronous>, transform_indices = @transform_10, window_bounds = array<i64: 1, 128>}, {pipeline_mode = #tpu.pipeline_mode<synchronous>, transform_indices = @transform_11, window_bounds = array<i64: 128, 128>}, {pipeline_mode = #tpu.pipeline_mode<synchronous>, transform_indices = @transform_12, window_bounds = array<i64: 1, 128>}, {pipeline_mode = #tpu.pipeline_mode<synchronous>, transform_indices = @transform_13, window_bounds = array<i64: 128, 128>}, {pipeline_mode = #tpu.pipeline_mode<synchronous>, transform_indices = @transform_14, window_bounds = array<i64: 1, 128>}, {transform_indices = @transform_15, window_bounds = array<i64: 128, 128>}]} {
    %c0 = arith.constant 0 : index
    %c0_0 = arith.constant 0 : index
    %0 = vector.load %arg1[%c0, %c0_0] : memref<128x128xf32, #tpu.memory_space<vmem>>, vector<128x128xf32>
    %1 = arith.truncf %0 : vector<128x128xf32> to vector<128x128xbf16>
    %c0_1 = arith.constant 0 : index
    %c0_2 = arith.constant 0 : index
    %c0_3 = arith.constant 0 : index
    %2 = vector.load %arg2[%c0_1, %c0_2, %c0_3] : memref<2x128x128xbf16, #tpu.memory_space<vmem>>, vector<1x128x128xbf16>
    %3 = vector.shape_cast %2 : vector<1x128x128xbf16> to vector<128x128xbf16>
    %cst = arith.constant dense<0.000000e+00> : vector<128x128xf32>
    %4 = tpu.matmul %1, %3, %cst {dimension_numbers = #tpu.dot_dimension_numbers<[1], [0], [0], [1], [0, 0, 1, 1], [], []>} : vector<128x128xbf16>, vector<128x128xbf16>, vector<128x128xf32> -> vector<128x128xf32>
    %c0_4 = arith.constant 0 : index
    %c0_5 = arith.constant 0 : index
    %c0_6 = arith.constant 0 : index
    %5 = vector.load %arg3[%c0_4, %c0_5, %c0_6] : memref<2x1x128xf32, #tpu.memory_space<vmem>>, vector<1x1x128xf32>
    %6 = vector.shape_cast %5 : vector<1x1x128xf32> to vector<1x128xf32>
    %7 = vector.broadcast %6 : vector<1x128xf32> to vector<128x128xf32>
    %8 = arith.addf %4, %7 : vector<128x128xf32>
    %cst_7 = arith.constant 0.000000e+00 : f32
    %9 = vector.broadcast %cst_7 : f32 to vector<128x128xf32>
    %10 = arith.maximumf %8, %9 : vector<128x128xf32>
    %11 = arith.truncf %10 : vector<128x128xf32> to vector<128x128xbf16>
    %c0_8 = arith.constant 0 : index
    %c0_9 = arith.constant 0 : index
    %c0_10 = arith.constant 0 : index
    %12 = vector.load %arg4[%c0_8, %c0_9, %c0_10] : memref<2x128x128xbf16, #tpu.memory_space<vmem>>, vector<1x128x128xbf16>
    %13 = vector.shape_cast %12 : vector<1x128x128xbf16> to vector<128x128xbf16>
    %cst_11 = arith.constant dense<0.000000e+00> : vector<128x128xf32>
    %14 = tpu.matmul %11, %13, %cst_11 {dimension_numbers = #tpu.dot_dimension_numbers<[1], [0], [0], [1], [0, 0, 1, 1], [], []>} : vector<128x128xbf16>, vector<128x128xbf16>, vector<128x128xf32> -> vector<128x128xf32>
    %c0_12 = arith.constant 0 : index
    %c0_13 = arith.constant 0 : index
    %c0_14 = arith.constant 0 : index
    %15 = vector.load %arg5[%c0_12, %c0_13, %c0_14] : memref<2x1x128xf32, #tpu.memory_space<vmem>>, vector<1x1x128xf32>
    %16 = vector.shape_cast %15 : vector<1x1x128xf32> to vector<1x128xf32>
    %17 = vector.broadcast %16 : vector<1x128xf32> to vector<128x128xf32>
    %18 = arith.addf %14, %17 : vector<128x128xf32>
    %cst_15 = arith.constant 0.000000e+00 : f32
    %19 = vector.broadcast %cst_15 : f32 to vector<128x128xf32>
    %20 = arith.maximumf %18, %19 : vector<128x128xf32>
    %21 = arith.truncf %20 : vector<128x128xf32> to vector<128x128xbf16>
    %c0_16 = arith.constant 0 : index
    %c0_17 = arith.constant 0 : index
    %c0_18 = arith.constant 0 : index
    %22 = vector.load %arg6[%c0_16, %c0_17, %c0_18] : memref<2x128x128xbf16, #tpu.memory_space<vmem>>, vector<1x128x128xbf16>
    %23 = vector.shape_cast %22 : vector<1x128x128xbf16> to vector<128x128xbf16>
    %cst_19 = arith.constant dense<0.000000e+00> : vector<128x128xf32>
    %24 = tpu.matmul %21, %23, %cst_19 {dimension_numbers = #tpu.dot_dimension_numbers<[1], [0], [0], [1], [0, 0, 1, 1], [], []>} : vector<128x128xbf16>, vector<128x128xbf16>, vector<128x128xf32> -> vector<128x128xf32>
    %c0_20 = arith.constant 0 : index
    %c0_21 = arith.constant 0 : index
    %c0_22 = arith.constant 0 : index
    %25 = vector.load %arg7[%c0_20, %c0_21, %c0_22] : memref<2x1x128xf32, #tpu.memory_space<vmem>>, vector<1x1x128xf32>
    %26 = vector.shape_cast %25 : vector<1x1x128xf32> to vector<1x128xf32>
    %27 = vector.broadcast %26 : vector<1x128xf32> to vector<128x128xf32>
    %28 = arith.addf %24, %27 : vector<128x128xf32>
    %29 = arith.addf %0, %28 : vector<128x128xf32>
    %c0_23 = arith.constant 0 : index
    %c0_24 = arith.constant 0 : index
    %c0_25 = arith.constant 0 : index
    %30 = vector.load %arg8[%c0_23, %c0_24, %c0_25] : memref<2x1x128xf32, #tpu.memory_space<vmem>>, vector<1x1x128xf32>
    %31 = vector.shape_cast %30 : vector<1x1x128xf32> to vector<1x128xf32>
    %32 = vector.broadcast %31 : vector<1x128xf32> to vector<128x128xf32>
    %33 = arith.addf %29, %32 : vector<128x128xf32>
    %c0_26 = arith.constant 0 : index
    %c0_27 = arith.constant 0 : index
    %c0_28 = arith.constant 0 : index
    %34 = vector.load %arg9[%c0_26, %c0_27, %c0_28] : memref<2x1x128xf32, #tpu.memory_space<vmem>>, vector<1x1x128xf32>
    %35 = vector.shape_cast %34 : vector<1x1x128xf32> to vector<1x128xf32>
    %36 = vector.broadcast %35 : vector<1x128xf32> to vector<128x128xf32>
    %37 = arith.mulf %33, %36 : vector<128x128xf32>
    %cst_29 = arith.constant 0.000000e+00 : f32
    %38 = vector.broadcast %cst_29 : f32 to vector<128x128xf32>
    %39 = arith.maximumf %37, %38 : vector<128x128xf32>
    %40 = arith.truncf %39 : vector<128x128xf32> to vector<128x128xbf16>
    %c1 = arith.constant 1 : index
    %c0_30 = arith.constant 0 : index
    %c0_31 = arith.constant 0 : index
    %41 = vector.load %arg2[%c1, %c0_30, %c0_31] : memref<2x128x128xbf16, #tpu.memory_space<vmem>>, vector<1x128x128xbf16>
    %42 = vector.shape_cast %41 : vector<1x128x128xbf16> to vector<128x128xbf16>
    %cst_32 = arith.constant dense<0.000000e+00> : vector<128x128xf32>
    %43 = tpu.matmul %40, %42, %cst_32 {dimension_numbers = #tpu.dot_dimension_numbers<[1], [0], [0], [1], [0, 0, 1, 1], [], []>} : vector<128x128xbf16>, vector<128x128xbf16>, vector<128x128xf32> -> vector<128x128xf32>
    %c1_33 = arith.constant 1 : index
    %c0_34 = arith.constant 0 : index
    %c0_35 = arith.constant 0 : index
    %44 = vector.load %arg3[%c1_33, %c0_34, %c0_35] : memref<2x1x128xf32, #tpu.memory_space<vmem>>, vector<1x1x128xf32>
    %45 = vector.shape_cast %44 : vector<1x1x128xf32> to vector<1x128xf32>
    %46 = vector.broadcast %45 : vector<1x128xf32> to vector<128x128xf32>
    %47 = arith.addf %43, %46 : vector<128x128xf32>
    %cst_36 = arith.constant 0.000000e+00 : f32
    %48 = vector.broadcast %cst_36 : f32 to vector<128x128xf32>
    %49 = arith.maximumf %47, %48 : vector<128x128xf32>
    %50 = arith.truncf %49 : vector<128x128xf32> to vector<128x128xbf16>
    %c1_37 = arith.constant 1 : index
    %c0_38 = arith.constant 0 : index
    %c0_39 = arith.constant 0 : index
    %51 = vector.load %arg4[%c1_37, %c0_38, %c0_39] : memref<2x128x128xbf16, #tpu.memory_space<vmem>>, vector<1x128x128xbf16>
    %52 = vector.shape_cast %51 : vector<1x128x128xbf16> to vector<128x128xbf16>
    %cst_40 = arith.constant dense<0.000000e+00> : vector<128x128xf32>
    %53 = tpu.matmul %50, %52, %cst_40 {dimension_numbers = #tpu.dot_dimension_numbers<[1], [0], [0], [1], [0, 0, 1, 1], [], []>} : vector<128x128xbf16>, vector<128x128xbf16>, vector<128x128xf32> -> vector<128x128xf32>
    %c1_41 = arith.constant 1 : index
    %c0_42 = arith.constant 0 : index
    %c0_43 = arith.constant 0 : index
    %54 = vector.load %arg5[%c1_41, %c0_42, %c0_43] : memref<2x1x128xf32, #tpu.memory_space<vmem>>, vector<1x1x128xf32>
    %55 = vector.shape_cast %54 : vector<1x1x128xf32> to vector<1x128xf32>
    %56 = vector.broadcast %55 : vector<1x128xf32> to vector<128x128xf32>
    %57 = arith.addf %53, %56 : vector<128x128xf32>
    %cst_44 = arith.constant 0.000000e+00 : f32
    %58 = vector.broadcast %cst_44 : f32 to vector<128x128xf32>
    %59 = arith.maximumf %57, %58 : vector<128x128xf32>
    %60 = arith.truncf %59 : vector<128x128xf32> to vector<128x128xbf16>
    %c1_45 = arith.constant 1 : index
    %c0_46 = arith.constant 0 : index
    %c0_47 = arith.constant 0 : index
    %61 = vector.load %arg6[%c1_45, %c0_46, %c0_47] : memref<2x128x128xbf16, #tpu.memory_space<vmem>>, vector<1x128x128xbf16>
    %62 = vector.shape_cast %61 : vector<1x128x128xbf16> to vector<128x128xbf16>
    %cst_48 = arith.constant dense<0.000000e+00> : vector<128x128xf32>
    %63 = tpu.matmul %60, %62, %cst_48 {dimension_numbers = #tpu.dot_dimension_numbers<[1], [0], [0], [1], [0, 0, 1, 1], [], []>} : vector<128x128xbf16>, vector<128x128xbf16>, vector<128x128xf32> -> vector<128x128xf32>
    %c1_49 = arith.constant 1 : index
    %c0_50 = arith.constant 0 : index
    %c0_51 = arith.constant 0 : index
    %64 = vector.load %arg7[%c1_49, %c0_50, %c0_51] : memref<2x1x128xf32, #tpu.memory_space<vmem>>, vector<1x1x128xf32>
    %65 = vector.shape_cast %64 : vector<1x1x128xf32> to vector<1x128xf32>
    %66 = vector.broadcast %65 : vector<1x128xf32> to vector<128x128xf32>
    %67 = arith.addf %63, %66 : vector<128x128xf32>
    %68 = arith.addf %39, %67 : vector<128x128xf32>
    %c1_52 = arith.constant 1 : index
    %c0_53 = arith.constant 0 : index
    %c0_54 = arith.constant 0 : index
    %69 = vector.load %arg8[%c1_52, %c0_53, %c0_54] : memref<2x1x128xf32, #tpu.memory_space<vmem>>, vector<1x1x128xf32>
    %70 = vector.shape_cast %69 : vector<1x1x128xf32> to vector<1x128xf32>
    %71 = vector.broadcast %70 : vector<1x128xf32> to vector<128x128xf32>
    %72 = arith.addf %68, %71 : vector<128x128xf32>
    %c1_55 = arith.constant 1 : index
    %c0_56 = arith.constant 0 : index
    %c0_57 = arith.constant 0 : index
    %73 = vector.load %arg9[%c1_55, %c0_56, %c0_57] : memref<2x1x128xf32, #tpu.memory_space<vmem>>, vector<1x1x128xf32>
    %74 = vector.shape_cast %73 : vector<1x1x128xf32> to vector<1x128xf32>
    %75 = vector.broadcast %74 : vector<1x128xf32> to vector<128x128xf32>
    %76 = arith.mulf %72, %75 : vector<128x128xf32>
    %cst_58 = arith.constant 0.000000e+00 : f32
    %77 = vector.broadcast %cst_58 : f32 to vector<128x128xf32>
    %78 = arith.maximumf %76, %77 : vector<128x128xf32>
    %79 = arith.truncf %78 : vector<128x128xf32> to vector<128x128xbf16>
    %c0_59 = arith.constant 0 : index
    %c0_60 = arith.constant 0 : index
    %80 = vector.load %arg10[%c0_59, %c0_60] : memref<128x128xbf16, #tpu.memory_space<vmem>>, vector<128x128xbf16>
    %cst_61 = arith.constant dense<0.000000e+00> : vector<128x128xf32>
    %81 = tpu.matmul %79, %80, %cst_61 {dimension_numbers = #tpu.dot_dimension_numbers<[1], [0], [0], [1], [0, 0, 1, 1], [], []>} : vector<128x128xbf16>, vector<128x128xbf16>, vector<128x128xf32> -> vector<128x128xf32>
    %c0_62 = arith.constant 0 : index
    %c0_63 = arith.constant 0 : index
    %82 = vector.load %arg11[%c0_62, %c0_63] : memref<1x128xf32, #tpu.memory_space<vmem>>, vector<1x128xf32>
    %83 = vector.broadcast %82 : vector<1x128xf32> to vector<128x128xf32>
    %84 = arith.addf %81, %83 : vector<128x128xf32>
    %cst_64 = arith.constant 0.000000e+00 : f32
    %85 = vector.broadcast %cst_64 : f32 to vector<128x128xf32>
    %86 = arith.maximumf %84, %85 : vector<128x128xf32>
    %87 = arith.truncf %86 : vector<128x128xf32> to vector<128x128xbf16>
    %c0_65 = arith.constant 0 : index
    %c0_66 = arith.constant 0 : index
    %88 = vector.load %arg12[%c0_65, %c0_66] : memref<128x128xbf16, #tpu.memory_space<vmem>>, vector<128x128xbf16>
    %cst_67 = arith.constant dense<0.000000e+00> : vector<128x128xf32>
    %89 = tpu.matmul %87, %88, %cst_67 {dimension_numbers = #tpu.dot_dimension_numbers<[1], [0], [0], [1], [0, 0, 1, 1], [], []>} : vector<128x128xbf16>, vector<128x128xbf16>, vector<128x128xf32> -> vector<128x128xf32>
    %c0_68 = arith.constant 0 : index
    %c0_69 = arith.constant 0 : index
    %90 = vector.load %arg13[%c0_68, %c0_69] : memref<1x128xf32, #tpu.memory_space<vmem>>, vector<1x128xf32>
    %91 = vector.broadcast %90 : vector<1x128xf32> to vector<128x128xf32>
    %92 = arith.addf %89, %91 : vector<128x128xf32>
    %cst_70 = arith.constant 0.000000e+00 : f32
    %93 = vector.broadcast %cst_70 : f32 to vector<128x128xf32>
    %94 = arith.maximumf %92, %93 : vector<128x128xf32>
    %95 = arith.truncf %94 : vector<128x128xf32> to vector<128x128xbf16>
    %c0_71 = arith.constant 0 : index
    %c0_72 = arith.constant 0 : index
    %96 = vector.load %arg14[%c0_71, %c0_72] : memref<128x128xbf16, #tpu.memory_space<vmem>>, vector<128x128xbf16>
    %cst_73 = arith.constant dense<0.000000e+00> : vector<128x128xf32>
    %97 = tpu.matmul %95, %96, %cst_73 {dimension_numbers = #tpu.dot_dimension_numbers<[1], [0], [0], [1], [0, 0, 1, 1], [], []>} : vector<128x128xbf16>, vector<128x128xbf16>, vector<128x128xf32> -> vector<128x128xf32>
    %c0_74 = arith.constant 0 : index
    %c0_75 = arith.constant 0 : index
    %98 = vector.load %arg15[%c0_74, %c0_75] : memref<1x128xf32, #tpu.memory_space<vmem>>, vector<1x128xf32>
    %99 = vector.broadcast %98 : vector<1x128xf32> to vector<128x128xf32>
    %100 = arith.addf %97, %99 : vector<128x128xf32>
    %c0_76 = arith.constant 0 : index
    %c0_77 = arith.constant 0 : index
    %101 = vector.load %arg16[%c0_76, %c0_77] : memref<128x128xf32, #tpu.memory_space<vmem>>, vector<128x128xf32>
    tpu.vector_store %arg16[%c0_76, %c0_77], %100 {strides = array<i32>} : memref<128x128xf32, #tpu.memory_space<vmem>>, vector<128x128xf32>,
    return
  }
  func.func @transform_0(%arg0: i32) -> (i32, i32) {
    %c0_i32 = arith.constant 0 : i32
    %c0_i32_0 = arith.constant 0 : i32
    return %arg0, %c0_i32 : i32, i32
  }
  func.func @transform_1(%arg0: i32) -> (i32, i32, i32) {
    %c0_i32 = arith.constant 0 : i32
    %c0_i32_0 = arith.constant 0 : i32
    %c0_i32_1 = arith.constant 0 : i32
    %c0_i32_2 = arith.constant 0 : i32
    return %c0_i32, %c0_i32_0, %c0_i32_1 : i32, i32, i32
  }
  func.func @transform_2(%arg0: i32) -> (i32, i32, i32) {
    %c0_i32 = arith.constant 0 : i32
    %c0_i32_0 = arith.constant 0 : i32
    %c0_i32_1 = arith.constant 0 : i32
    %c0_i32_2 = arith.constant 0 : i32
    return %c0_i32, %c0_i32_0, %c0_i32_1 : i32, i32, i32
  }
  func.func @transform_3(%arg0: i32) -> (i32, i32, i32) {
    %c0_i32 = arith.constant 0 : i32
    %c0_i32_0 = arith.constant 0 : i32
    %c0_i32_1 = arith.constant 0 : i32
    %c0_i32_2 = arith.constant 0 : i32
    return %c0_i32, %c0_i32_0, %c0_i32_1 : i32, i32, i32
  }
  func.func @transform_4(%arg0: i32) -> (i32, i32, i32) {
    %c0_i32 = arith.constant 0 : i32
    %c0_i32_0 = arith.constant 0 : i32
    %c0_i32_1 = arith.constant 0 : i32
    %c0_i32_2 = arith.constant 0 : i32
    return %c0_i32, %c0_i32_0, %c0_i32_1 : i32, i32, i32
  }
  func.func @transform_5(%arg0: i32) -> (i32, i32, i32) {
    %c0_i32 = arith.constant 0 : i32
    %c0_i32_0 = arith.constant 0 : i32
    %c0_i32_1 = arith.constant 0 : i32
    %c0_i32_2 = arith.constant 0 : i32
    return %c0_i32, %c0_i32_0, %c0_i32_1 : i32, i32, i32
  }
  func.func @transform_6(%arg0: i32) -> (i32, i32, i32) {
    %c0_i32 = arith.constant 0 : i32
    %c0_i32_0 = arith.constant 0 : i32
    %c0_i32_1 = arith.constant 0 : i32
    %c0_i32_2 = arith.constant 0 : i32
    return %c0_i32, %c0_i32_0, %c0_i32_1 : i32, i32, i32
  }
  func.func @transform_7(%arg0: i32) -> (i32, i32, i32) {
    %c0_i32 = arith.constant 0 : i32
    %c0_i32_0 = arith.constant 0 : i32
    %c0_i32_1 = arith.constant 0 : i32
    %c0_i32_2 = arith.constant 0 : i32
    return %c0_i32, %c0_i32_0, %c0_i32_1 : i32, i32, i32
  }
  func.func @transform_8(%arg0: i32) -> (i32, i32, i32) {
    %c0_i32 = arith.constant 0 : i32
    %c0_i32_0 = arith.constant 0 : i32
    %c0_i32_1 = arith.constant 0 : i32
    %c0_i32_2 = arith.constant 0 : i32
    return %c0_i32, %c0_i32_0, %c0_i32_1 : i32, i32, i32
  }
  func.func @transform_9(%arg0: i32) -> (i32, i32) {
    %c0_i32 = arith.constant 0 : i32
    %c0_i32_0 = arith.constant 0 : i32
    %c0_i32_1 = arith.constant 0 : i32
    return %c0_i32, %c0_i32_0 : i32, i32
  }
  func.func @transform_10(%arg0: i32) -> (i32, i32) {
    %c0_i32 = arith.constant 0 : i32
    %c0_i32_0 = arith.constant 0 : i32
    %c0_i32_1 = arith.constant 0 : i32
    return %c0_i32, %c0_i32_0 : i32, i32
  }
  func.func @transform_11(%arg0: i32) -> (i32, i32) {
    %c0_i32 = arith.constant 0 : i32
    %c0_i32_0 = arith.constant 0 : i32
    %c0_i32_1 = arith.constant 0 : i32
    return %c0_i32, %c0_i32_0 : i32, i32
  }
  func.func @transform_12(%arg0: i32) -> (i32, i32) {
    %c0_i32 = arith.constant 0 : i32
    %c0_i32_0 = arith.constant 0 : i32
    %c0_i32_1 = arith.constant 0 : i32
    return %c0_i32, %c0_i32_0 : i32, i32
  }
  func.func @transform_13(%arg0: i32) -> (i32, i32) {
    %c0_i32 = arith.constant 0 : i32
    %c0_i32_0 = arith.constant 0 : i32
    %c0_i32_1 = arith.constant 0 : i32
    return %c0_i32, %c0_i32_0 : i32, i32
  }
  func.func @transform_14(%arg0: i32) -> (i32, i32) {
    %c0_i32 = arith.constant 0 : i32
    %c0_i32_0 = arith.constant 0 : i32
    %c0_i32_1 = arith.constant 0 : i32
    return %c0_i32, %c0_i32_0 : i32, i32
  }
  func.func @transform_15(%arg0: i32) -> (i32, i32) {
    %c0_i32 = arith.constant 0 : i32
    %c0_i32_0 = arith.constant 0 : i32
    return %arg0, %c0_i32 : i32, i32
  }
}

</mosaic_0001>

<bundles_post_ra>
// kernel: tpu_custom_call.1
= control target key start
LH: loop header
LB: loop body
LE: loop exit
PB: predicated region body
PF: predicated region fallthrough
CT: control target
= control target key end

     0   :  { %s4489_s0 = inlined_call_operand.hbm [shape: f32[256,128], index: 0, kind: input, shape index: {}]   ;;  %s4490_s1 = inlined_call_operand.hbm [shape: bf16[2,128,128], index: 1, kind: input, shape index: {}]   ;;  %s4491_s2 = inlined_call_operand.vmem [shape: f32[2,1,128], index: 2, kind: input, shape index: {}]   ;;  %s4492_s3 = inlined_call_operand.hbm [shape: bf16[2,128,128], index: 3, kind: input, shape index: {}]   ;;  %s4493_s4 = inlined_call_operand.vmem [shape: f32[2,1,128], index: 4, kind: input, shape index: {}]   ;;  %s4494_s5 = inlined_call_operand.hbm [shape: bf16[2,128,128], index: 5, kind: input, shape index: {}]   ;;  %s4495_s6 = inlined_call_operand.vmem [shape: f32[2,1,128], index: 6, kind: input, shape index: {}]   ;;  %s4496_s7 = inlined_call_operand.vmem [shape: f32[2,1,128], index: 7, kind: input, shape index: {}]   ;;  %s4497_s8 = inlined_call_operand.vmem [shape: f32[2,1,128], index: 8, kind: input, shape index: {}]   ;;  %s4498_s9 = inlined_call_operand.hbm [shape: bf16[128,128], index: 9, kind: input, shape index: {}]   ;;  %s4499_s10 = inlined_call_operand.vmem [shape: f32[1,128], index: 10, kind: input, shape index: {}]   ;;  %s4500_s11 = inlined_call_operand.hbm [shape: bf16[128,128], index: 11, kind: input, shape index: {}]   ;;  %s4501_s12 = inlined_call_operand.vmem [shape: f32[1,128], index: 12, kind: input, shape index: {}]   ;;  %s4502_s13 = inlined_call_operand.hbm [shape: bf16[128,128], index: 13, kind: input, shape index: {}]   ;;  %s4503_s14 = inlined_call_operand.vmem [shape: f32[1,128], index: 14, kind: input, shape index: {}]   ;;  %s4504_s15 = inlined_call_operand.hbm [shape: f32[256,128], index: 15, kind: output, shape index: {}]  }
   0x1   :  { %4512 = sst [smem:[#allocation20_spill]] %s4489_s0 }
   0x2   :  { %4513 = sst [smem:[#allocation21_spill]] %s4490_s1 }
   0x3   :  { %4514 = sst [smem:[#allocation22_spill]] %s4495_s6 }
   0x4   :  { %4515 = sst [smem:[#allocation23_spill]] %s4496_s7 }
   0x5   :  { %4516 = sst [smem:[#allocation24_spill]] %s4497_s8 }
   0x6   :  { %4517 = sst [smem:[#allocation25_spill]] %s4499_s10 }
   0x7   :  { %4518 = sst [smem:[#allocation26_spill]] %s4501_s12 }
   0x8   :  { %4519 = sst [smem:[#allocation27_spill]] %s4503_s14 }
   0x9   :  { %4520 = sst [smem:[#allocation28_spill]] %s4504_s15 }
   0xa   :  { %20 = vsyncpa [#allocation3], 0 }
   0xb   :  { %22 = vsyncpa [#allocation3 + $0x1], 0 }
   0xc   :  { %23 = vsyncpa [#allocation6], 0 }
   0xd   :  { %24 = vsyncpa [#allocation9], 0 }
   0xe   :  { %25 = vsyncpa [#allocation12], 0 }
   0xf   :  { %26 = vsyncpa [#allocation4], 0 }
  0x10   :  { %28 = vsyncpa [#allocation4 + $0x1], 0  ;;  %s3746_s18 = smov 0   ;;  %s3748_s19 = smov 0  }
  0x11   :  { %s3750_s20 = smov 0   ;;  %s3752_s21 = smov 0  }
  0x12 LB: > { %s3652_s22 = smov [#allocation5]   ;;  %s3767_s24 = sadd.s32 4294967295, %s3650_s21   ;;  %s3650_s21 = sphi %s3752_s21, %s4553_s21   ;;  %s3646_s20 = sphi %s3750_s20, %s4552_s20   ;;  %s3642_s19 = sphi %s3748_s19, %s4551_s19   ;;  %s3638_s18 = sphi %s3746_s18, %s4550_s18  }
  0x13   : > { %s397_s23 = sshll.u32 %s3652_s22, 4  ;;  %p2624_p0 = scmp.ge.s32.totalorder %s3650_s21, 1  ;;  %s3772_s23 = int_to_ptr.vmem [resolvable:$true] %s397_s23 }
  0x14   : > { %p4509_p1 = scmp.eq.s32.totalorder %s3767_s24, 0  ;;  %p385_p2 = scmp.lt.s32.totalorder %s3650_s21, 3 }
  0x15   : > { %s3653_s26 = smov [#allocation8]   ;;  %s3654_s29 = smov [#allocation11]  }
  0x16   : > { %p3774_p3 = pnand %p2624_p0, %p385_p2  ;;  %s429_s27 = sshll.u32 %s3653_s26, 4  ;;  %s3787_s27 = int_to_ptr.vmem [resolvable:$true] %s429_s27 }
  0x17   : > { %s467_s30 = sshll.u32 %s3654_s29, 4  ;;  %s4523_s1 = sld [smem:[#allocation21_spill]]  ;;  %s3789_s30 = int_to_ptr.vmem [resolvable:$true] %s467_s30 }
  0x18   : > { %s4521_s25 = scalar_select %p3774_p3, 1, 0 }
  0x19   : > { %p3217_p5 = pneg %p3774_p3 }
  0x1b   : > { %p3783_p6 = pnand %p3217_p5, %p4509_p1 }
  0x1d   : > { %s3374_s22 = scalar_lea.hbm %s4523_s1, 2048  ;;  %p3799_p8 = pneg %p3783_p6 }
  0x1e   : > { %p3375_p7 = scmp.ne.s32.totalorder %s4523_s1, %s3374_s22  ;;  %p3381_p11 = scmp.lt.u32.totalorder %s3374_s22, %s4523_s1 }
  0x20   : > { %p3377_p9 = pnand %p3799_p8, %p3375_p7 }
  0x22   : > { %p3378_p10 = pneg %p3377_p9 }
  0x24   : > { %p3383_p12 = pnand %p3381_p11, %p3378_p10 }
  0x26   : > { %3386 = shalt.err (!%p3383_p12)
}
  0x27   : > { %s3387_s14 = scalar_lea.vmem %s3772_s23, 2048  ;;  %p3395_p5 = scmp.lt.s32.totalorder %s3772_s23, %s3772_s23 }
  0x28   : > { %p3388_p13 = scmp.ne.s32.totalorder %s3772_s23, %s3387_s14  ;;  %p3396_p4 = scmp.lt.s32.totalorder %s3387_s14, %s3387_s14 }
  0x2a   : > { %p3390_p0 = pnand %p3388_p13, %p3799_p8  ;;  %p3397_p7 = por %p3396_p4, %p3395_p5 }
  0x2c   : > { %p3391_p2 = pneg %p3390_p0 }
  0x2e   : > { %p3398_p9 = pnand %p3397_p7, %p3391_p2 }
  0x30   : > { %3401 = shalt.err (!%p3398_p9)
}
  0x31   : > { %s3655_s15 = smov 64   ;;  %s3656_s12 = smov 4  }
  0x32   : > { %3220 = dma.hbm_to_vmem [thread:$0]  (!%p3783_p6), %s4523_s1, 2048, %s3772_s23, [#allocation6], %s3655_s15, %s3655_s15, %s3656_s12  }
  0x33   : > { %s3402_s14 = scalar_lea.hbm %s4494_s5, 2048 }
  0x34   : > { %p3403_p4 = scmp.ne.s32.totalorder %s4494_s5, %s3402_s14  ;;  %p3409_p12 = scmp.lt.u32.totalorder %s3402_s14, %s4494_s5 }
  0x36   : > { %p3405_p10 = pnand %p3403_p4, %p3799_p8 }
  0x38   : > { %p3406_p11 = pneg %p3405_p10 }
  0x3a   : > { %p3411_p13 = pnand %p3409_p12, %p3406_p11 }
  0x3c   : > { %3414 = shalt.err (!%p3411_p13)
}
  0x3d   : > { %s3415_s23 = scalar_lea.vmem %s3787_s27, 2048  ;;  %p3423_p7 = scmp.lt.s32.totalorder %s3787_s27, %s3787_s27 }
  0x3e   : > { %p3416_p0 = scmp.ne.s32.totalorder %s3787_s27, %s3415_s23  ;;  %p3424_p9 = scmp.lt.s32.totalorder %s3415_s23, %s3415_s23 }
  0x40   : > { %p3418_p2 = pnand %p3416_p0, %p3799_p8  ;;  %p3425_p4 = por %p3424_p9, %p3423_p7 }
  0x42   : > { %p3419_p5 = pneg %p3418_p2 }
  0x44   : > { %p3426_p10 = pnand %p3425_p4, %p3419_p5 }
  0x46   : > { %3429 = shalt.err (!%p3426_p10)
}
  0x47   : > { %3226 = dma.hbm_to_vmem [thread:$0]  (!%p3783_p6), %s4494_s5, 2048, %s3787_s27, [#allocation9], %s3655_s15, %s3655_s15, %s3656_s12  }
  0x48   : > { %s3430_s16 = scalar_lea.hbm %s4500_s11, 1024 }
  0x49   : > { %p3431_p11 = scmp.ne.s32.totalorder %s4500_s11, %s3430_s16  ;;  %p3437_p0 = scmp.lt.u32.totalorder %s3430_s16, %s4500_s11 }
  0x4b   : > { %p3433_p12 = pnand %p3431_p11, %p3799_p8 }
  0x4d   : > { %p3434_p13 = pneg %p3433_p12 }
  0x4f   : > { %p3439_p2 = pnand %p3437_p0, %p3434_p13 }
  0x51   : > { %3442 = shalt.err (!%p3439_p2)
}
  0x52   : > { %s3443_s27 = scalar_lea.vmem %s3789_s30, 1024  ;;  %p3451_p4 = scmp.lt.s32.totalorder %s3789_s30, %s3789_s30 }
  0x53   : > { %p3444_p5 = scmp.ne.s32.totalorder %s3789_s30, %s3443_s27  ;;  %p3452_p10 = scmp.lt.s32.totalorder %s3443_s27, %s3443_s27 }
  0x55   : > { %p3446_p7 = pnand %p3444_p5, %p3799_p8  ;;  %p3453_p11 = por %p3452_p10, %p3451_p4 }
  0x57   : > { %p3447_p9 = pneg %p3446_p7 }
  0x59   : > { %p3454_p12 = pnand %p3453_p11, %p3447_p9 }
  0x5b   : > { %3457 = shalt.err (!%p3454_p12)
}
  0x5c   : > { %3232 = dma.hbm_to_vmem [thread:$0]  (!%p3783_p6), %s4500_s11, 1024, %s3789_s30, [#allocation12], %s3655_s15, %s3655_s15, %s3656_s12  }
  0x5d   : > { %s3657_s7 = smov [#allocation7]   ;;  %s3658_s10 = smov [#allocation10]  }
  0x5e   : > { %s413_s8 = sshll.u32 %s3657_s7, 4  ;;  %s451_s16 = sshll.u32 %s3658_s10, 4  ;;  %s414_s8 = int_to_ptr.vmem [resolvable:$true] %s413_s8  ;;  %s452_s16 = int_to_ptr.vmem [resolvable:$true] %s451_s16 }
  0x5f   : > { %s3458_s29 = scalar_lea.hbm %s4492_s3, 2048 }
  0x60   : > { %p3459_p13 = scmp.ne.s32.totalorder %s4492_s3, %s3458_s29  ;;  %p3465_p5 = scmp.lt.u32.totalorder %s3458_s29, %s4492_s3 }
  0x62   : > { %p3461_p0 = pnand %p3459_p13, %p3799_p8 }
  0x64   : > { %p3462_p2 = pneg %p3461_p0 }
  0x66   : > { %p3467_p7 = pnand %p3465_p5, %p3462_p2 }
  0x68   : > { %3470 = shalt.err (!%p3467_p7)
}
  0x69   : > { %s3471_s30 = scalar_lea.vmem %s414_s8, 2048  ;;  %p3479_p11 = scmp.lt.s32.totalorder %s414_s8, %s414_s8 }
  0x6a   : > { %p3472_p9 = scmp.ne.s32.totalorder %s414_s8, %s3471_s30  ;;  %p3480_p12 = scmp.lt.s32.totalorder %s3471_s30, %s3471_s30 }
  0x6c   : > { %p3474_p4 = pnand %p3472_p9, %p3799_p8  ;;  %p3481_p1 = por %p3480_p12, %p3479_p11 }
  0x6e   : > { %p3475_p10 = pneg %p3474_p4 }
  0x70   : > { %p3482_p3 = pnand %p3481_p1, %p3475_p10 }
  0x72   : > { %3485 = shalt.err (!%p3482_p3)
}
  0x73   : > { %3223 = dma.hbm_to_vmem [thread:$0]  (!%p3783_p6), %s4492_s3, 2048, %s414_s8, [#allocation6], %s3655_s15, %s3655_s15, %s3656_s12  }
  0x74   : > { %s3486_s17 = scalar_lea.hbm %s4498_s9, 1024 }
  0x75   : > { %p3487_p1 = scmp.ne.s32.totalorder %s4498_s9, %s3486_s17  ;;  %p3493_p0 = scmp.lt.u32.totalorder %s3486_s17, %s4498_s9 }
  0x77   : > { %p3489_p3 = pnand %p3487_p1, %p3799_p8 }
  0x79   : > { %p3490_p13 = pneg %p3489_p3 }
  0x7b   : > { %p3495_p2 = pnand %p3493_p0, %p3490_p13 }
  0x7d   : > { %3498 = shalt.err (!%p3495_p2)
}
  0x7e   : > { %s3499_s23 = scalar_lea.vmem %s452_s16, 1024  ;;  %p3507_p4 = scmp.lt.s32.totalorder %s452_s16, %s452_s16 }
  0x7f   : > { %p3500_p5 = scmp.ne.s32.totalorder %s452_s16, %s3499_s23  ;;  %p3508_p10 = scmp.lt.s32.totalorder %s3499_s23, %s3499_s23 }
  0x81   : > { %p3502_p7 = pnand %p3500_p5, %p3799_p8  ;;  %p3509_p11 = por %p3508_p10, %p3507_p4 }
  0x83   : > { %p3503_p9 = pneg %p3502_p7 }
  0x85   : > { %p3510_p12 = pnand %p3509_p11, %p3503_p9 }
  0x87   : > { %3513 = shalt.err (!%p3510_p12)
}
  0x88   : > { %3229 = dma.hbm_to_vmem [thread:$0]  (!%p3783_p6), %s4498_s9, 1024, %s452_s16, [#allocation9], %s3655_s15, %s3655_s15, %s3656_s12  }
  0x89   : > { %s3659_s1 = smov [#allocation13]   ;;  %s3514_s17 = scalar_lea.hbm %s4502_s13, 1024 }
  0x8a   : > { %s483_s6 = sshll.u32 %s3659_s1, 4  ;;  %p3515_p1 = scmp.ne.s32.totalorder %s4502_s13, %s3514_s17  ;;  %s484_s6 = int_to_ptr.vmem [resolvable:$true] %s483_s6 }
  0x8b   : > { %p3521_p0 = scmp.lt.u32.totalorder %s3514_s17, %s4502_s13 }
  0x8c   : > { %p3517_p3 = pnand %p3515_p1, %p3799_p8 }
  0x8e   : > { %p3518_p13 = pneg %p3517_p3 }
  0x90   : > { %p3523_p2 = pnand %p3521_p0, %p3518_p13 }
  0x92   : > { %3526 = shalt.err (!%p3523_p2)
}
  0x93   : > { %s3527_s16 = scalar_lea.vmem %s484_s6, 1024  ;;  %p3535_p4 = scmp.lt.s32.totalorder %s484_s6, %s484_s6 }
  0x94   : > { %p3528_p5 = scmp.ne.s32.totalorder %s484_s6, %s3527_s16  ;;  %p3536_p10 = scmp.lt.s32.totalorder %s3527_s16, %s3527_s16 }
  0x96   : > { %p3530_p7 = pnand %p3528_p5, %p3799_p8  ;;  %p3537_p11 = por %p3536_p10, %p3535_p4 }
  0x98   : > { %p3531_p9 = pneg %p3530_p7 }
  0x9a   : > { %p3538_p12 = pnand %p3537_p11, %p3531_p9 }
  0x9c   : > { %3541 = shalt.err (!%p3538_p12)
}
  0x9d   : > { %3235 = dma.hbm_to_vmem [thread:$0]  (!%p3783_p6), %s4502_s13, 1024, %s484_s6, [#allocation12], %s3655_s15, %s3655_s15, %s3656_s12  }
  0x9e   : > { %s2623_s28 = sadd.s32 4294967294, %s3650_s21   ;;  %s3940_s26 = sadd.s32 1, %s3650_s21  }
  0x9f   : > { %s38_s30 = ssub.s32 %s3650_s21, %s3940_s26  ;;  %s41_s1 = sadd.s32 1, %s3646_s20 }
  0xa0   : > { %p39_p8 = scmp.eq.s32.totalorder %s38_s30, 0  ;;  %p48_p1 = scmp.ne.s32.totalorder %s3646_s20, %s3642_s19 }
  0xa1   : > { %p49_p3 = scmp.eq.s32.totalorder %s3650_s21, 0  ;;  %p54_p13 = scmp.ne.s32.totalorder %s3642_s19, %s3638_s18 }
  0xa2   : > { %s3951_s7 = scalar_select %p39_p8, %s3646_s20, %s41_s1  }
  0xa3   : > { %p3953_p0 = por %p49_p3, %p48_p1  ;;  %p4526_p2 = scmp.eq.s32.totalorder %s3767_s24, 0 }
  0xa4   : > { %p372_p5 = scmp.eq.s32.totalorder %s3767_s24, 1  ;;  %p378_p7 = scmp.eq.s32.totalorder %s2623_s28, 1 }
  0xa5   : > { %p3959_p6 = por %p4526_p2, %p54_p13  ;;  %p3250_p9 = scmp.lt.s32.totalorder %s3650_s21, 2 }
  0xa6   : > { %s500_s12 = sand.u32 1, %s3646_s20   ;;  %p3966_p4 = por %p372_p5, %p48_p1 }
  0xa7   : > { %p3970_p10 = por %p378_p7, %p54_p13  ;;  %s2632_s22 = sshll.u32 %s500_s12, 7 }
  0xa8   : > { %s4528_s6 = scalar_select %p3966_p4, 1, 0 }
  0xa9   : > { %s4529_s17 = scalar_select %p3970_p10, 1, 0 }
  0xaa   : > { %s2739_s29 = sshll.u32 %s3650_s21, 11  ;;  %s4530_s0 = sld [smem:[#allocation20_spill]] }
  0xab   : > { %s504_s23 = scalar_lea.vmem [#allocation2], %s2632_s22  ;;  %p3984_p11 = pnand %p3250_p9, %p3953_p0 }
  0xac   : > { %s511_s8 = sshll.u32 %s504_s23, 4  ;;  %s3988_s30 = scalar_lea.sflag [#allocation3], %s500_s12  ;;  %s3980_s8 = int_to_ptr.vmem [resolvable:$true] %s511_s8 }
  0xad   : > { %p3544_p8 = pneg %p3984_p11 }
  0xb0   : > { %s3978_s16 = scalar_lea.hbm %s4530_s0, %s2739_s29  ;;  %s3547_s10 = scalar_lea.hbm %s4530_s0, 4096 }
  0xb1   : > { %s3542_s1 = scalar_lea.hbm %s3978_s16, 2048  ;;  %p3548_p13 = scmp.lt.u32.totalorder %s3978_s16, %s4530_s0 }
  0xb2   : > { %p3543_p12 = scmp.ne.s32.totalorder %s3978_s16, %s3542_s1  ;;  %p3549_p0 = scmp.lt.u32.totalorder %s3547_s10, %s3542_s1 }
  0xb3   : > { %p3551_p5 = scmp.lt.u32.totalorder %s3542_s1, %s3978_s16 }
  0xb4   : > { %p3545_p1 = pnand %p3544_p8, %p3543_p12  ;;  %p3550_p2 = por %p3549_p0, %p3548_p13 }
  0xb6   : > { %p3546_p3 = pneg %p3545_p1  ;;  %p3552_p7 = por %p3551_p5, %p3550_p2 }
  0xb8   : > { %p3553_p9 = pnand %p3552_p7, %p3546_p3 }
  0xba   : > { %3556 = shalt.err (!%p3553_p9)
}
  0xbb   : > { %s3557_s12 = scalar_lea.vmem %s3980_s8, 2048  ;;  %s3660_s23 = smov [#allocation2]  }
  0xbc   : > { %p3558_p12 = scmp.ne.s32.totalorder %s3980_s8, %s3557_s12  ;;  %s3562_s22 = sshll.u32 %s3660_s23, 4  ;;  %s3563_s22 = int_to_ptr.vmem [resolvable:$false] %s3562_s22 }
  0xbd   : > { %s3564_s29 = scalar_lea.vmem %s3563_s22, 4096  ;;  %p3565_p4 = scmp.lt.s32.totalorder %s3980_s8, %s3563_s22 }
  0xbe   : > { %p3560_p1 = pnand %p3558_p12, %p3544_p8  ;;  %p3566_p13 = scmp.lt.s32.totalorder %s3564_s29, %s3557_s12 }
  0xc0   : > { %p3561_p10 = pneg %p3560_p1  ;;  %p3567_p0 = por %p3566_p13, %p3565_p4 }
  0xc2   : > { %p3568_p2 = pnand %p3567_p0, %p3561_p10 }
  0xc4   : > { %3571 = shalt.err (!%p3568_p2)
}
  0xc5   : > { %s3661_s1 = smov 128   ;;  %s3662_s10 = smov 8  }
  0xc6   : > { %3239 = dma.hbm_to_vmem [thread:$0]  (!%p3984_p11), %s3978_s16, 2048, %s3980_s8, %s3988_s30, %s3661_s1, %s3661_s1, %s3662_s10  }
  0xc7   : > { %p4532_p8 = scmp.ne.s32.totalorder %s4521_s25, 0 }
  0xc8   : > { %s4019_s14 = sand.u32 (!%p4532_p8), 1, %s3642_s19  }
  0xc9   : > { %523 = sbr.rel (%p4532_p8) target bundleno = 2297 (0x8f9), region = 80  ;;  %s2636_s27 = sshll.u32 (!%p4532_p8), %s4019_s14, 7 }
  0xca   : > { %s526_s12 = scalar_lea.sflag (!%p4532_p8), [#allocation3], %s4019_s14  ;;  %s4025_s23 = scalar_lea.vmem (!%p4532_p8), [#allocation2], %s2636_s27 }
  0xd0   : > { %3617 = dma.done.wait (%p3959_p6), %s526_s12, 2048  }
  0xd1   : > { %3619 = vsyncadd (%p3959_p6), %s526_s12, 4294965248  ;;  %p4533_p4 = scmp.eq.s32.totalorder %s3767_s24, 0 }
  0xd3   : > { %3621 = dma.done.wait (%p4533_p4), [#allocation6], 4096   ;;  %p4534_p10 = pmov %p4533_p4 }
  0xd4   : > { %p4535_p11 = pmov %p4533_p4 }
  0xd5   : > { %3623 = vsyncadd (%p4534_p10), [#allocation6], 4294963200 }
  0xd6   : > { %3625 = dma.done.wait (%p4535_p11), [#allocation9], 3072   ;;  %p4536_p3 = pmov %p4533_p4 }
  0xd8   : > { %3627 = vsyncadd (%p4536_p3), [#allocation9], 4294964224  ;;  %p4537_p5 = pmov %p4536_p3 }
  0xd9   : > { %p4538_p7 = pmov %p4536_p3 }
  0xda   : > { %3629 = dma.done.wait (%p4537_p5), [#allocation12], 2048  }
  0xdb   : > { %3631 = vsyncadd (%p4538_p7), [#allocation12], 4294965248  ;;  %v3302_v0 = vld [vmem:[#allocation5] sm:$0xff]   ;;  %v3303_v1 = vld [vmem:[#allocation5 + $0x8] sm:$0xff]   ;;  %s4539_s22 = sld [smem:[#allocation22_spill]]  ;;  %s4540_s10 = sld [smem:[#allocation23_spill]] }
  0xdc   : > { %2885 = vmatprep.subr.bf16.mxu0 %v3302_v0  ;;  %v3304_v2 = vld [vmem:[#allocation5 + $0x10] sm:$0xff]   ;;  %v3305_v3 = vld [vmem:[#allocation5 + $0x18] sm:$0xff]   ;;  %v4044_v4 = vld [vmem:[%s4025_s23] sm:$0xff]  ;;  %s4541_s25 = sld [smem:[#allocation24_spill]]  ;;  %s4542_s28 = sld [smem:[#allocation25_spill]] }
  0xdd   : > { %2886 = vmatpush3.bf16.msra.mxu0 %v3302_v0  ;;  %v4047_v5 = vld [vmem:[%s4025_s23 + $0x8] sm:$0xff]  ;;  %v3306_v7 = vld [vmem:[#allocation5 + $0x20] sm:$0xff]   ;;  %v3312_v11 = vld [vmem:[#allocation7 + $0x10] sm:$0xff]   ;;  %s4543_s1 = sld [smem:[#allocation26_spill]]  ;;  %s4544_s15 = sld [smem:[#allocation27_spill]] }
  0xde   : > { %2887 = vmatprep.subr.bf16.mxu0 %v3303_v1  ;;  %v619_v6 = vpack.c.bf16 %v4047_v5, %v4044_v4  ;;  %v3310_v8 = vld [vmem:[#allocation7] sm:$0xff]   ;;  %v3311_v9 = vld [vmem:[#allocation7 + $0x8] sm:$0xff]   ;;  %v3308_v12 = vld [vmem:[#allocation5 + $0x30] sm:$0xff]   ;;  %s4420_s16 = scalar_lea.vmem [#allocation14], %s2636_s27  ;;  %s2740_s27 = sshll.u32 %s3767_s24, 11 }
  0xdf   : > { %v3307_v10 = vld [vmem:[#allocation5 + $0x28] sm:$0xff]   ;;  %2917 = vmatprep.subr.bf16.mxu1 %v3310_v8  ;;  %v3313_v13 = vld [vmem:[#allocation7 + $0x18] sm:$0xff]   ;;  %v3314_v15 = vld [vmem:[#allocation7 + $0x20] sm:$0xff]   ;;  %s2493_s8 = sshll.u32 %s4420_s16, 4  ;;  %s4545_s29 = sld [smem:[#allocation28_spill]]  ;;  %s4442_s8 = int_to_ptr.vmem [resolvable:$true] %s2493_s8 }
  0xe0   : > { %2901 = vmatprep.mubr.bf16.mxu0 %v619_v6  ;;  %2918 = vmatpush3.bf16.msra.mxu1 %v3310_v8  ;;  %v3309_v14 = vld [vmem:[#allocation5 + $0x38] sm:$0xff]   ;;  %v4052_v16 = vld [vmem:[%s4025_s23 + $0x10] sm:$0xff]  ;;  %v4058_v18 = vld [vmem:[%s4025_s23 + $0x20] sm:$0xff]  ;;  %s3572_s12 = scalar_lea.vmem %s4442_s8, 2048  ;;  %p4546_p9 = scmp.ne.s32.totalorder %s4528_s6, 0 }
  0xe1   : > { %2888 = vmatpush3.bf16.msra.mxu0 %v3303_v1  ;;  %2919 = vmatprep.subr.bf16.mxu1 %v3311_v9  ;;  %v4055_v17 = vld [vmem:[%s4025_s23 + $0x18] sm:$0xff]  ;;  %v4061_v19 = vld [vmem:[%s4025_s23 + $0x28] sm:$0xff]  ;;  %v4068_v23 = vld [vmem:[%s4025_s23 + $0x30] sm:$0xff]  ;;  %p3573_p6 = scmp.ne.s32.totalorder %s4442_s8, %s3572_s12 }
  0xe2   : > { %2889 = vmatprep.subr.bf16.mxu0 %v3304_v2  ;;  %v3315_v20 = vld [vmem:[#allocation7 + $0x28] sm:$0xff]   ;;  %v620_v21 = vpack.c.bf16 %v4055_v17, %v4052_v16  ;;  %v621_v22 = vpack.c.bf16 %v4061_v19, %v4058_v18  ;;  %v4071_v24 = vld [vmem:[%s4025_s23 + $0x38] sm:$0xff]  ;;  %v4074_v25 = vld [vmem:[%s4025_s23 + $0x40] sm:$0xff] }
  0xe3   : > { %v4077_v26 = vld [vmem:[%s4025_s23 + $0x48] sm:$0xff]  ;;  %v622_v27 = vpack.c.bf16 %v4071_v24, %v4068_v23  ;;  %v4084_v29 = vld [vmem:[%s4025_s23 + $0x50] sm:$0xff]  ;;  %v4087_v30 = vld [vmem:[%s4025_s23 + $0x58] sm:$0xff]  ;;  %p3574_p12 = pnand %p3573_p6, %p4546_p9 }
  0xe4   : > { %2920 = vmatpush3.bf16.msra.mxu1 %v3311_v9  ;;  %v623_v28 = vpack.c.bf16 %v4077_v26, %v4074_v25  ;;  %v4090_v31 = vld [vmem:[%s4025_s23 + $0x60] sm:$0xff]  ;;  %v4093_v32 = vld [vmem:[%s4025_s23 + $0x68] sm:$0xff]  ;;  %v624_v33 = vpack.c.bf16 %v4087_v30, %v4084_v29  ;;  %v4100_v35 = vld [vmem:[%s4025_s23 + $0x70] sm:$0xff] }
  0xe5   : > { %2890 = vmatpush3.bf16.msra.mxu0 %v3304_v2  ;;  %2921 = vmatprep.subr.bf16.mxu1 %v3312_v11  ;;  %v625_v34 = vpack.c.bf16 %v4093_v32, %v4090_v31  ;;  %v4103_v36 = vld [vmem:[%s4025_s23 + $0x78] sm:$0xff]  ;;  %v3316_v38 = vld [vmem:[#allocation7 + $0x30] sm:$0xff]   ;;  %v3318_v40 = vld [vmem:[#allocation8] sm:$0xff]   ;;  %p3575_p1 = pneg %p3574_p12  ;;  %s3663_s23 = smov [#allocation14]  }
  0xe6   : > { %2891 = vmatprep.subr.bf16.mxu0 %v3305_v3  ;;  %v626_v37 = vpack.c.bf16 %v4103_v36, %v4100_v35  ;;  %v3317_v39 = vld [vmem:[#allocation7 + $0x38] sm:$0xff]   ;;  %v3319_v41 = vld [vmem:[#allocation8 + $0x8] sm:$0xff]   ;;  %v3320_v42 = vld [vmem:[#allocation8 + $0x10] sm:$0xff]  }
  0xe7   : > { %v3321_v43 = vld [vmem:[#allocation8 + $0x18] sm:$0xff]   ;;  %v3322_v44 = vld [vmem:[#allocation8 + $0x20] sm:$0xff]   ;;  %v3323_v45 = vld [vmem:[#allocation8 + $0x28] sm:$0xff]  }
  0xe8   : > { %2922 = vmatpush3.bf16.msra.mxu1 %v3312_v11  ;;  %v2644_v46 = vld [vmem:[%s4491_s2] ss:$0 sm:$0xff] }
  0xe9   : > { %2892 = vmatpush3.bf16.msra.mxu0 %v3305_v3  ;;  %2923 = vmatprep.subr.bf16.mxu1 %v3313_v13 }
  0xea   : > { %2893 = vmatprep.subr.bf16.mxu0 %v3306_v7 }
  0xec   : > { %2924 = vmatpush3.bf16.msra.mxu1 %v3313_v13 }
  0xed   : > { %2894 = vmatpush3.bf16.msra.mxu0 %v3306_v7  ;;  %2925 = vmatprep.subr.bf16.mxu1 %v3314_v15 }
  0xee   : > { %2895 = vmatprep.subr.bf16.mxu0 %v3307_v10 }
  0xf0   : > { %2926 = vmatpush3.bf16.msra.mxu1 %v3314_v15 }
  0xf1   : > { %2896 = vmatpush3.bf16.msra.mxu0 %v3307_v10  ;;  %2927 = vmatprep.subr.bf16.mxu1 %v3315_v20 }
  0xf2   : > { %2897 = vmatprep.subr.bf16.mxu0 %v3308_v12 }
  0xf4   : > { %2928 = vmatpush3.bf16.msra.mxu1 %v3315_v20 }
  0xf5   : > { %2898 = vmatpush3.bf16.msra.mxu0 %v3308_v12  ;;  %2929 = vmatprep.subr.bf16.mxu1 %v3316_v38 }
  0xf6   : > { %2899 = vmatprep.subr.bf16.mxu0 %v3309_v14 }
  0xf8   : > { %2930 = vmatpush3.bf16.msra.mxu1 %v3316_v38 }
  0xf9   : > { %2900 = vmatpush3.bf16.msra.mxu0 %v3309_v14  ;;  %2931 = vmatprep.subr.bf16.mxu1 %v3317_v39 }
  0xfa   : > { %2949 = vmatprep.subr.bf16.mxu0 %v3318_v40 }
  0xfc   : > { %2902 = vmatmul.mubr.bf16.vlgmr.msra.gmra.mrb[0].mxu0 %v620_v21  ;;  %2932 = vmatpush3.bf16.msra.mxu1 %v3317_v39 }
  0xfd   : > { %2905 = vmatprep.mubr.bf16.mxu0 %v621_v22  ;;  %2950 = vmatpush3.bf16.msra.mxu0 %v3318_v40 }
  0xfe   : > { %2951 = vmatprep.subr.bf16.mxu0 %v3319_v41 }
 0x101   : > { %2952 = vmatpush3.bf16.msra.mxu0 %v3319_v41 }
 0x102   : > { %2953 = vmatprep.subr.bf16.mxu0 %v3320_v42 }
 0x104   : > { %2906 = vmatmul.mubr.bf16.gmra.mrb[4].mxu0 %v622_v27 }
 0x105   : > { %2909 = vmatprep.mubr.bf16.mxu0 %v623_v28  ;;  %2954 = vmatpush3.bf16.msra.mxu0 %v3320_v42 }
 0x106   : > { %2955 = vmatprep.subr.bf16.mxu0 %v3321_v43 }
 0x109   : > { %2956 = vmatpush3.bf16.msra.mxu0 %v3321_v43 }
 0x10a   : > { %2957 = vmatprep.subr.bf16.mxu0 %v3322_v44 }
 0x10c   : > { %2910 = vmatmul.mubr.bf16.gmra.mrb[8].mxu0 %v624_v33 }
 0x10d   : > { %2913 = vmatprep.mubr.bf16.mxu0 %v625_v34  ;;  %2958 = vmatpush3.bf16.msra.mxu0 %v3322_v44 }
 0x10e   : > { %2959 = vmatprep.subr.bf16.mxu0 %v3323_v45 }
 0x111   : > { %2960 = vmatpush3.bf16.msra.mxu0 %v3323_v45 }
 0x114   : > { %2914 = vmatmul.mubr.bf16.gmra.mrb[12].mxu0 %v626_v37 }
 0x1cf   : > { %v2903_v47 = vpop.f32.mrb[0].mxu0 }
 0x1d0   : > { %v741_v48 = vadd.f32 %v2903_v47, %v2644_v46  ;;  %v732_v49 = vpop.f32.mrb[1].mxu0 }
 0x1d1   : > { %v733_v50 = vadd.f32 %v2644_v46, %v732_v49  ;;  %v2904_v51 = vpop.f32.mrb[2].mxu0 }
 0x1d2   : > { %v744_v52 = vadd.f32 %v2904_v51, %v2644_v46  ;;  %v735_v53 = vpop.f32.mrb[3].mxu0  ;;  %v797_v55 = vmax.f32 %v741_v48, 0.0 }
 0x1d3   : > { %v736_v54 = vadd.f32 %v2644_v46, %v735_v53  ;;  %v795_v57 = vmax.f32 %v733_v50, 0.0 }
 0x1d4   : > { %v798_v56 = vmax.f32 %v744_v52, 0.0 }
 0x1d5   : > { %v796_v58 = vmax.f32 %v736_v54, 0.0 }
 0x1d6   : > { %v812_v59 = vpack.c.bf16 %v798_v56, %v797_v55  ;;  %v3324_v56 = vld [vmem:[#allocation8 + $0x30] sm:$0xff]  }
 0x1d7   : > { %v2907_v60 = vpop.f32.mrb[4].mxu0  ;;  %v811_v61 = vpack.c.bf16 %v796_v58, %v795_v57  ;;  %2961 = vmatprep.subr.bf16.mxu0 %v3324_v56  ;;  %v3325_v57 = vld [vmem:[#allocation8 + $0x38] sm:$0xff]   ;;  %v3326_v58 = vld [vmem:[#allocation5 + $0x40] sm:$0xff]  }
 0x1d8   : > { %v757_v62 = vadd.f32 %v2907_v60, %v2644_v46  ;;  %v748_v63 = vpop.f32.mrb[5].mxu0  ;;  %2962 = vmatpush3.bf16.msra.mxu0 %v3324_v56  ;;  %2981 = vmatprep.subr.bf16.mxu1 %v3326_v58  ;;  %v3329_v60 = vld [vmem:[#allocation5 + $0x58] sm:$0xff]  }
 0x1d9   : > { %v749_v0 = vadd.f32 %v2644_v46, %v748_v63  ;;  %v2908_v1 = vpop.f32.mrb[6].mxu0  ;;  %2933 = vmatprep.mubr.bf16.mxu1 %v811_v61  ;;  %2963 = vmatprep.subr.bf16.mxu0 %v3325_v57  ;;  %v2653_v61 = vld [vmem:[%s4493_s4] ss:$0 sm:$0xff] }
 0x1da   : > { %v760_v2 = vadd.f32 %v2908_v1, %v2644_v46  ;;  %v751_v3 = vpop.f32.mrb[7].mxu0  ;;  %2934 = vmatmul.mubr.bf16.vlgmr.msra.gmra.mrb[0].mxu1 %v812_v59  ;;  %v801_v7 = vmax.f32 %v757_v62, 0.0  ;;  %v3327_v59 = vld [vmem:[#allocation5 + $0x48] sm:$0xff]  }
 0x1db   : > { %v752_v6 = vadd.f32 %v2644_v46, %v751_v3  ;;  %v799_v9 = vmax.f32 %v749_v0, 0.0  ;;  %2982 = vmatpush3.bf16.msra.mxu1 %v3326_v58 }
 0x1dc   : > { %v802_v8 = vmax.f32 %v760_v2, 0.0  ;;  %2964 = vmatpush3.bf16.msra.mxu0 %v3325_v57  ;;  %2983 = vmatprep.subr.bf16.mxu1 %v3327_v59 }
 0x1dd   : > { %v800_v10 = vmax.f32 %v752_v6, 0.0 }
 0x1de   : > { %v814_v11 = vpack.c.bf16 %v802_v8, %v801_v7 }
 0x1df   : > { %v813_v12 = vpack.c.bf16 %v800_v10, %v799_v9  ;;  %v2911_v13 = vpop.f32.mrb[8].mxu0  ;;  %2984 = vmatpush3.bf16.msra.mxu1 %v3327_v59 }
 0x1e0   : > { %v773_v14 = vadd.f32 %v2911_v13, %v2644_v46  ;;  %v764_v15 = vpop.f32.mrb[9].mxu0 }
 0x1e1   : > { %v765_v20 = vadd.f32 %v2644_v46, %v764_v15  ;;  %v2912_v21 = vpop.f32.mrb[10].mxu0  ;;  %2937 = vmatprep.mubr.bf16.mxu1 %v813_v12 }
 0x1e2   : > { %v776_v22 = vadd.f32 %v2912_v21, %v2644_v46  ;;  %v767_v27 = vpop.f32.mrb[11].mxu0  ;;  %2938 = vmatmul.mubr.bf16.gmra.mrb[4].mxu1 %v814_v11  ;;  %v805_v33 = vmax.f32 %v773_v14, 0.0 }
 0x1e3   : > { %v768_v28 = vadd.f32 %v2644_v46, %v767_v27  ;;  %v803_v37 = vmax.f32 %v765_v20, 0.0 }
 0x1e4   : > { %v806_v34 = vmax.f32 %v776_v22, 0.0 }
 0x1e5   : > { %v804_v38 = vmax.f32 %v768_v28, 0.0 }
 0x1e6   : > { %v816_v39 = vpack.c.bf16 %v806_v34, %v805_v33 }
 0x1e7   : > { %v815_v40 = vpack.c.bf16 %v804_v38, %v803_v37  ;;  %v2915_v41 = vpop.f32.mrb[12].mxu0 }
 0x1e8   : > { %v789_v42 = vadd.f32 %v2915_v41, %v2644_v46  ;;  %v780_v43 = vpop.f32.mrb[13].mxu0 }
 0x1e9   : > { %v781_v44 = vadd.f32 %v2644_v46, %v780_v43  ;;  %v2916_v45 = vpop.f32.mrb[14].mxu0  ;;  %2941 = vmatprep.mubr.bf16.mxu1 %v815_v40 }
 0x1ea   : > { %v792_v47 = vadd.f32 %v2916_v45, %v2644_v46  ;;  %v783_v48 = vpop.f32.mrb[15].mxu0  ;;  %2942 = vmatmul.mubr.bf16.gmra.mrb[8].mxu1 %v816_v39  ;;  %v809_v50 = vmax.f32 %v789_v42, 0.0 }
 0x1eb   : > { %v784_v49 = vadd.f32 %v2644_v46, %v783_v48  ;;  %v807_v52 = vmax.f32 %v781_v44, 0.0  ;;  %v3328_v46 = vld [vmem:[#allocation5 + $0x50] sm:$0xff]  }
 0x1ec   : > { %v810_v51 = vmax.f32 %v792_v47, 0.0  ;;  %2985 = vmatprep.subr.bf16.mxu1 %v3328_v46 }
 0x1ed   : > { %v808_v53 = vmax.f32 %v784_v49, 0.0  ;;  %2986 = vmatpush3.bf16.msra.mxu1 %v3328_v46 }
 0x1ee   : > { %v818_v54 = vpack.c.bf16 %v810_v51, %v809_v50  ;;  %2987 = vmatprep.subr.bf16.mxu1 %v3329_v60 }
 0x1ef   : > { %v817_v55 = vpack.c.bf16 %v808_v53, %v807_v52 }
 0x1f1   : > { %2945 = vmatprep.mubr.bf16.mxu1 %v817_v55  ;;  %2988 = vmatpush3.bf16.msra.mxu1 %v3329_v60 }
 0x1f2   : > { %2946 = vmatmul.mubr.bf16.gmra.mrb[12].mxu1 %v818_v54 }
 0x2ad   : > { %v2935_v62 = vpop.f32.mrb[0].mxu1 }
 0x2ae   : > { %v933_v63 = vadd.f32 %v2935_v62, %v2653_v61  ;;  %v924_v0 = vpop.f32.mrb[1].mxu1 }
 0x2af   : > { %v925_v1 = vadd.f32 %v2653_v61, %v924_v0  ;;  %v2936_v2 = vpop.f32.mrb[2].mxu1 }
 0x2b0   : > { %v936_v3 = vadd.f32 %v2936_v2, %v2653_v61  ;;  %v927_v6 = vpop.f32.mrb[3].mxu1  ;;  %v989_v8 = vmax.f32 %v933_v63, 0.0 }
 0x2b1   : > { %v928_v7 = vadd.f32 %v2653_v61, %v927_v6  ;;  %v987_v10 = vmax.f32 %v925_v1, 0.0 }
 0x2b2   : > { %v990_v9 = vmax.f32 %v936_v3, 0.0 }
 0x2b3   : > { %v988_v11 = vmax.f32 %v928_v7, 0.0 }
 0x2b4   : > { %v1004_v12 = vpack.c.bf16 %v990_v9, %v989_v8  ;;  %v3330_v9 = vld [vmem:[#allocation5 + $0x60] sm:$0xff]  }
 0x2b5   : > { %v1003_v13 = vpack.c.bf16 %v988_v11, %v987_v10  ;;  %v2939_v14 = vpop.f32.mrb[4].mxu1  ;;  %2989 = vmatprep.subr.bf16.mxu1 %v3330_v9  ;;  %v3331_v10 = vld [vmem:[#allocation5 + $0x68] sm:$0xff]   ;;  %v3332_v11 = vld [vmem:[#allocation5 + $0x70] sm:$0xff]  }
 0x2b6   : > { %v949_v15 = vadd.f32 %v2939_v14, %v2653_v61  ;;  %v940_v20 = vpop.f32.mrb[5].mxu1  ;;  %2990 = vmatpush3.bf16.msra.mxu1 %v3330_v9  ;;  %v3336_v14 = vld [vmem:[#allocation7 + $0x50] sm:$0xff]  }
 0x2b7   : > { %v941_v21 = vadd.f32 %v2653_v61, %v940_v20  ;;  %v2940_v22 = vpop.f32.mrb[6].mxu1  ;;  %2965 = vmatprep.mubr.bf16.mxu0 %v1003_v13  ;;  %2991 = vmatprep.subr.bf16.mxu1 %v3331_v10  ;;  %v3335_v13 = vld [vmem:[#allocation7 + $0x48] sm:$0xff]   ;;  %v3338_v20 = vld [vmem:[#allocation7 + $0x60] sm:$0xff]  }
 0x2b8   : > { %v952_v27 = vadd.f32 %v2940_v22, %v2653_v61  ;;  %v943_v28 = vpop.f32.mrb[7].mxu1  ;;  %2966 = vmatmul.mubr.bf16.vlgmr.msra.gmra.mrb[16].mxu0 %v1004_v12  ;;  %v993_v34 = vmax.f32 %v949_v15, 0.0  ;;  %v3333_v12 = vld [vmem:[#allocation5 + $0x78] sm:$0xff]   ;;  %v4116_v22 = vld [vmem:[%s4539_s22] ss:$0 sm:$0xff] }
 0x2b9   : > { %v944_v33 = vadd.f32 %v2653_v61, %v943_v28  ;;  %v991_v38 = vmax.f32 %v941_v21, 0.0  ;;  %v3337_v15 = vld [vmem:[#allocation7 + $0x58] sm:$0xff]   ;;  %v3339_v21 = vld [vmem:[#allocation7 + $0x68] sm:$0xff]  }
 0x2ba   : > { %v994_v37 = vmax.f32 %v952_v27, 0.0  ;;  %2992 = vmatpush3.bf16.msra.mxu1 %v3331_v10 }
 0x2bb   : > { %v992_v39 = vmax.f32 %v944_v33, 0.0  ;;  %2993 = vmatprep.subr.bf16.mxu1 %v3332_v11 }
 0x2bc   : > { %v1006_v40 = vpack.c.bf16 %v994_v37, %v993_v34  ;;  %v4122_v34 = vld [vmem:[%s4540_s10] ss:$0 sm:$0xff] }
 0x2bd   : > { %v1005_v41 = vpack.c.bf16 %v992_v39, %v991_v38  ;;  %v2943_v42 = vpop.f32.mrb[8].mxu1 }
 0x2be   : > { %v965_v43 = vadd.f32 %v2943_v42, %v2653_v61  ;;  %v956_v44 = vpop.f32.mrb[9].mxu1  ;;  %2994 = vmatpush3.bf16.msra.mxu1 %v3332_v11 }
 0x2bf   : > { %v957_v45 = vadd.f32 %v2653_v61, %v956_v44  ;;  %v2944_v47 = vpop.f32.mrb[10].mxu1  ;;  %2969 = vmatprep.mubr.bf16.mxu0 %v1005_v41  ;;  %2995 = vmatprep.subr.bf16.mxu1 %v3333_v12 }
 0x2c0   : > { %v968_v48 = vadd.f32 %v2944_v47, %v2653_v61  ;;  %v959_v49 = vpop.f32.mrb[11].mxu1  ;;  %2970 = vmatmul.mubr.bf16.gmra.mrb[20].mxu0 %v1006_v40  ;;  %v997_v51 = vmax.f32 %v965_v43, 0.0 }
 0x2c1   : > { %v960_v50 = vadd.f32 %v2653_v61, %v959_v49  ;;  %v995_v53 = vmax.f32 %v957_v45, 0.0  ;;  %v4133_v45 = vld [vmem:[%s4541_s25] ss:$0 sm:$0xff] }
 0x2c2   : > { %v998_v52 = vmax.f32 %v968_v48, 0.0  ;;  %2996 = vmatpush3.bf16.msra.mxu1 %v3333_v12 }
 0x2c3   : > { %v996_v54 = vmax.f32 %v960_v50, 0.0 }
 0x2c4   : > { %v1008_v55 = vpack.c.bf16 %v998_v52, %v997_v51 }
 0x2c5   : > { %v1007_v56 = vpack.c.bf16 %v996_v54, %v995_v53  ;;  %v2947_v57 = vpop.f32.mrb[12].mxu1 }
 0x2c6   : > { %v981_v58 = vadd.f32 %v2947_v57, %v2653_v61  ;;  %v972_v59 = vpop.f32.mrb[13].mxu1 }
 0x2c7   : > { %v973_v46 = vadd.f32 %v2653_v61, %v972_v59  ;;  %v2948_v60 = vpop.f32.mrb[14].mxu1  ;;  %2973 = vmatprep.mubr.bf16.mxu0 %v1007_v56 }
 0x2c8   : > { %v984_v62 = vadd.f32 %v2948_v60, %v2653_v61  ;;  %v975_v63 = vpop.f32.mrb[15].mxu1  ;;  %2974 = vmatmul.mubr.bf16.gmra.mrb[24].mxu0 %v1008_v55  ;;  %v1001_v1 = vmax.f32 %v981_v58, 0.0 }
 0x2c9   : > { %v976_v0 = vadd.f32 %v2653_v61, %v975_v63  ;;  %v999_v3 = vmax.f32 %v973_v46, 0.0  ;;  %v3334_v61 = vld [vmem:[#allocation7 + $0x40] sm:$0xff]  }
 0x2ca   : > { %v1002_v2 = vmax.f32 %v984_v62, 0.0  ;;  %3013 = vmatprep.subr.bf16.mxu0 %v3334_v61 }
 0x2cb   : > { %v1000_v6 = vmax.f32 %v976_v0, 0.0  ;;  %3014 = vmatpush3.bf16.msra.mxu0 %v3334_v61 }
 0x2cc   : > { %v1010_v7 = vpack.c.bf16 %v1002_v2, %v1001_v1  ;;  %3015 = vmatprep.subr.bf16.mxu0 %v3335_v13 }
 0x2cd   : > { %v1009_v8 = vpack.c.bf16 %v1000_v6, %v999_v3 }
 0x2cf   : > { %2977 = vmatprep.mubr.bf16.mxu0 %v1009_v8  ;;  %3016 = vmatpush3.bf16.msra.mxu0 %v3335_v13 }
 0x2d0   : > { %2978 = vmatmul.mubr.bf16.gmra.mrb[28].mxu0 %v1010_v7  ;;  %3017 = vmatprep.subr.bf16.mxu0 %v3336_v14 }
 0x2d3   : > { %3018 = vmatpush3.bf16.msra.mxu0 %v3336_v14 }
 0x2d4   : > { %3019 = vmatprep.subr.bf16.mxu0 %v3337_v15 }
 0x2d7   : > { %3020 = vmatpush3.bf16.msra.mxu0 %v3337_v15 }
 0x2d8   : > { %3021 = vmatprep.subr.bf16.mxu0 %v3338_v20 }
 0x2db   : > { %3022 = vmatpush3.bf16.msra.mxu0 %v3338_v20 }
 0x2dc   : > { %3023 = vmatprep.subr.bf16.mxu0 %v3339_v21 }
 0x2df   : > { %3024 = vmatpush3.bf16.msra.mxu0 %v3339_v21 }
 0x38b   : > { %v2967_v27 = vpop.f32.mrb[16].mxu0 }
 0x38c   : > { %v1125_v28 = vadd.f32 %v2967_v27, %v4116_v22  ;;  %v1116_v33 = vpop.f32.mrb[17].mxu0 }
 0x38d   : > { %v1117_v37 = vadd.f32 %v4116_v22, %v1116_v33  ;;  %v2968_v38 = vpop.f32.mrb[18].mxu0 }
 0x38e   : > { %v1181_v39 = vadd.f32 %v1125_v28, %v4052_v16  ;;  %v1128_v40 = vadd.f32 %v2968_v38, %v4116_v22  ;;  %v1119_v41 = vpop.f32.mrb[19].mxu0 }
 0x38f   : > { %v1179_v42 = vadd.f32 %v1117_v37, %v4044_v4  ;;  %v1120_v43 = vadd.f32 %v4116_v22, %v1119_v41 }
 0x390   : > { %v1204_v44 = vadd.f32 %v4122_v34, %v1181_v39  ;;  %v1182_v47 = vadd.f32 %v1128_v40, %v4055_v17 }
 0x391   : > { %v1202_v48 = vadd.f32 %v4122_v34, %v1179_v42  ;;  %v1180_v16 = vadd.f32 %v1120_v43, %v4047_v5 }
 0x392   : > { %v1205_v49 = vadd.f32 %v4122_v34, %v1182_v47  ;;  %v4144_v52 = vmul.f32 %v4133_v45, %v1204_v44 }
 0x393   : > { %v1203_v50 = vadd.f32 %v4122_v34, %v1180_v16  ;;  %v2971_v4 = vpop.f32.mrb[20].mxu0  ;;  %v4141_v51 = vmul.f32 %v4133_v45, %v1202_v48 }
 0x394   : > { %v4147_v53 = vmul.f32 %v4133_v45, %v1205_v49  ;;  %v1141_v17 = vadd.f32 %v2971_v4, %v4116_v22  ;;  %v1132_v54 = vpop.f32.mrb[21].mxu0  ;;  %v1243_v1 = vmax.f32 %v4144_v52, 0.0 }
 0x395   : > { %v1133_v55 = vadd.f32 %v4116_v22, %v1132_v54  ;;  %v2972_v5 = vpop.f32.mrb[22].mxu0  ;;  %v4152_v56 = vmul.f32 %v4133_v45, %v1203_v50  ;;  %v1241_v63 = vmax.f32 %v4141_v51, 0.0 }
 0x396   : > { %v1244_v57 = vmax.f32 %v4147_v53, 0.0  ;;  %v1185_v58 = vadd.f32 %v1141_v17, %v4068_v23  ;;  %v1144_v59 = vadd.f32 %v2972_v5, %v4116_v22  ;;  %v1135_v46 = vpop.f32.mrb[23].mxu0 }
 0x397   : > { %v1183_v60 = vadd.f32 %v1133_v55, %v4058_v18  ;;  %v1136_v62 = vadd.f32 %v4116_v22, %v1135_v46  ;;  %v1242_v0 = vmax.f32 %v4152_v56, 0.0 }
 0x398   : > { %v1208_v2 = vadd.f32 %v4122_v34, %v1185_v58  ;;  %v1186_v3 = vadd.f32 %v1144_v59, %v4071_v24  ;;  %v1258_v7 = vpack.c.bf16 %v1244_v57, %v1243_v1 }
 0x399   : > { %v1206_v6 = vadd.f32 %v4122_v34, %v1183_v60  ;;  %v1184_v23 = vadd.f32 %v1136_v62, %v4061_v19  ;;  %v1257_v18 = vpack.c.bf16 %v1242_v0, %v1241_v63 }
 0x39a   : > { %v1209_v8 = vadd.f32 %v4122_v34, %v1186_v3  ;;  %v4181_v12 = vmul.f32 %v4133_v45, %v1208_v2 }
 0x39b   : > { %v1207_v9 = vadd.f32 %v4122_v34, %v1184_v23  ;;  %v2975_v10 = vpop.f32.mrb[24].mxu0  ;;  %2997 = vmatprep.mubr.bf16.mxu1 %v1257_v18  ;;  %v4177_v24 = vmul.f32 %v4133_v45, %v1206_v6 }
 0x39c   : > { %v1157_v19 = vadd.f32 %v2975_v10, %v4116_v22  ;;  %v1148_v11 = vpop.f32.mrb[25].mxu0  ;;  %2998 = vmatmul.mubr.bf16.vlgmr.msra.gmra.mrb[16].mxu1 %v1258_v7  ;;  %v4184_v61 = vmul.f32 %v4133_v45, %v1209_v8  ;;  %v1247_v42 = vmax.f32 %v4181_v12, 0.0 }
 0x39d   : > { %v1149_v13 = vadd.f32 %v4116_v22, %v1148_v11  ;;  %v2976_v14 = vpop.f32.mrb[26].mxu0  ;;  %v4188_v15 = vmul.f32 %v4133_v45, %v1207_v9  ;;  %v1245_v38 = vmax.f32 %v4177_v24, 0.0 }
 0x39e   : > { %v1189_v20 = vadd.f32 %v1157_v19, %v4084_v29  ;;  %v1160_v21 = vadd.f32 %v2976_v14, %v4116_v22  ;;  %v1151_v27 = vpop.f32.mrb[27].mxu0  ;;  %v1248_v28 = vmax.f32 %v4184_v61, 0.0 }
 0x39f   : > { %v1187_v33 = vadd.f32 %v1149_v13, %v4074_v25  ;;  %v1152_v37 = vadd.f32 %v4116_v22, %v1151_v27  ;;  %v1246_v39 = vmax.f32 %v4188_v15, 0.0  ;;  %v3341_v27 = vld [vmem:[#allocation7 + $0x78] sm:$0xff]  }
 0x3a0   : > { %v1212_v40 = vadd.f32 %v4122_v34, %v1189_v20  ;;  %v1190_v41 = vadd.f32 %v1160_v21, %v4087_v30  ;;  %v1260_v47 = vpack.c.bf16 %v1248_v28, %v1247_v42 }
 0x3a1   : > { %v1210_v29 = vadd.f32 %v4122_v34, %v1187_v33  ;;  %v1188_v43 = vadd.f32 %v1152_v37, %v4077_v26  ;;  %v1259_v25 = vpack.c.bf16 %v1246_v39, %v1245_v38  ;;  %v3342_v33 = vld [vmem:[#allocation8 + $0x40] sm:$0xff]   ;;  %v3343_v37 = vld [vmem:[#allocation8 + $0x48] sm:$0xff]  }
 0x3a2   : > { %v1213_v44 = vadd.f32 %v4122_v34, %v1190_v41  ;;  %v4217_v50 = vmul.f32 %v4133_v45, %v1212_v40  ;;  %3045 = vmatprep.subr.bf16.mxu1 %v3342_v33  ;;  %v3344_v40 = vld [vmem:[#allocation8 + $0x50] sm:$0xff]   ;;  %v3345_v41 = vld [vmem:[#allocation8 + $0x58] sm:$0xff]  }
 0x3a3   : > { %v1211_v30 = vadd.f32 %v4122_v34, %v1188_v43  ;;  %v2979_v48 = vpop.f32.mrb[28].mxu0  ;;  %3001 = vmatprep.mubr.bf16.mxu1 %v1259_v25  ;;  %v4213_v16 = vmul.f32 %v4133_v45, %v1210_v29  ;;  %3046 = vmatpush3.bf16.msra.mxu1 %v3342_v33  ;;  %v3346_v29 = vld [vmem:[#allocation8 + $0x60] sm:$0xff]   ;;  %v3347_v43 = vld [vmem:[#allocation8 + $0x68] sm:$0xff]  }
 0x3a4   : > { %v1173_v26 = vadd.f32 %v2979_v48, %v4116_v22  ;;  %v1164_v49 = vpop.f32.mrb[29].mxu0  ;;  %3002 = vmatmul.mubr.bf16.gmra.mrb[20].mxu1 %v1260_v47  ;;  %v4220_v4 = vmul.f32 %v4133_v45, %v1213_v44  ;;  %v1251_v18 = vmax.f32 %v4217_v50, 0.0  ;;  %3047 = vmatprep.subr.bf16.mxu1 %v3343_v37  ;;  %v2674_v25 = vld [vmem:[%s4491_s2 + $0x1] ss:$0 sm:$0xff] }
 0x3a5   : > { %v1165_v17 = vadd.f32 %v4116_v22, %v1164_v49  ;;  %v2980_v54 = vpop.f32.mrb[30].mxu0  ;;  %v4224_v55 = vmul.f32 %v4133_v45, %v1211_v30  ;;  %v1249_v2 = vmax.f32 %v4213_v16, 0.0 }
 0x3a6   : > { %v1193_v5 = vadd.f32 %v1173_v26, %v4100_v35  ;;  %v1176_v58 = vadd.f32 %v2980_v54, %v4116_v22  ;;  %v1167_v59 = vpop.f32.mrb[31].mxu0  ;;  %v1252_v46 = vmax.f32 %v4220_v4, 0.0 }
 0x3a7   : > { %v1191_v60 = vadd.f32 %v1165_v17, %v4090_v31  ;;  %v1168_v62 = vadd.f32 %v4116_v22, %v1167_v59  ;;  %v1250_v3 = vmax.f32 %v4224_v55, 0.0  ;;  %3048 = vmatpush3.bf16.msra.mxu1 %v3343_v37 }
 0x3a8   : > { %v1216_v6 = vadd.f32 %v4122_v34, %v1193_v5  ;;  %v1194_v23 = vadd.f32 %v1176_v58, %v4103_v36  ;;  %v1262_v8 = vpack.c.bf16 %v1252_v46, %v1251_v18  ;;  %3049 = vmatprep.subr.bf16.mxu1 %v3344_v40 }
 0x3a9   : > { %v1214_v35 = vadd.f32 %v4122_v34, %v1191_v60  ;;  %v1192_v7 = vadd.f32 %v1168_v62, %v4093_v32  ;;  %v1261_v31 = vpack.c.bf16 %v1250_v3, %v1249_v2 }
 0x3aa   : > { %v1217_v22 = vadd.f32 %v4122_v34, %v1194_v23  ;;  %v4252_v32 = vmul.f32 %v4133_v45, %v1216_v6 }
 0x3ab   : > { %v1215_v36 = vadd.f32 %v4122_v34, %v1192_v7  ;;  %3005 = vmatprep.mubr.bf16.mxu1 %v1261_v31  ;;  %v4249_v9 = vmul.f32 %v4133_v45, %v1214_v35  ;;  %3050 = vmatpush3.bf16.msra.mxu1 %v3344_v40 }
 0x3ac   : > { %3006 = vmatmul.mubr.bf16.gmra.mrb[24].mxu1 %v1262_v8  ;;  %v4255_v10 = vmul.f32 %v4133_v45, %v1217_v22  ;;  %v1255_v14 = vmax.f32 %v4252_v32, 0.0  ;;  %3051 = vmatprep.subr.bf16.mxu1 %v3345_v41 }
 0x3ad   : > { %v4258_v19 = vmul.f32 %v4133_v45, %v1215_v36  ;;  %v1253_v13 = vmax.f32 %v4249_v9, 0.0  ;;  %v3340_v45 = vld [vmem:[#allocation7 + $0x70] sm:$0xff]  }
 0x3ae   : > { %v1256_v11 = vmax.f32 %v4255_v10, 0.0  ;;  %3025 = vmatprep.subr.bf16.mxu0 %v3340_v45 }
 0x3af   : > { %v1254_v34 = vmax.f32 %v4258_v19, 0.0  ;;  %3026 = vmatpush3.bf16.msra.mxu0 %v3340_v45  ;;  %3052 = vmatpush3.bf16.msra.mxu1 %v3345_v41 }
 0x3b0   : > { %v1264_v21 = vpack.c.bf16 %v1256_v11, %v1255_v14  ;;  %3027 = vmatprep.subr.bf16.mxu0 %v3341_v27  ;;  %3053 = vmatprep.subr.bf16.mxu1 %v3346_v29 }
 0x3b1   : > { %v1263_v20 = vpack.c.bf16 %v1254_v34, %v1253_v13 }
 0x3b3   : > { %3009 = vmatprep.mubr.bf16.mxu1 %v1263_v20  ;;  %3028 = vmatpush3.bf16.msra.mxu0 %v3341_v27 }
 0x3b4   : > { %3010 = vmatmul.mubr.bf16.gmra.mrb[28].mxu1 %v1264_v21 }
 0x3b5   : > { %3054 = vmatpush3.bf16.msra.mxu1 %v3346_v29 }
 0x3b6   : > { %3055 = vmatprep.subr.bf16.mxu1 %v3347_v43 }
 0x3b9   : > { %3056 = vmatpush3.bf16.msra.mxu1 %v3347_v43 }
 0x46f   : > { %v2999_v44 = vpop.f32.mrb[16].mxu1 }
 0x470   : > { %v1381_v47 = vadd.f32 %v2999_v44, %v2674_v25  ;;  %v1372_v30 = vpop.f32.mrb[17].mxu1 }
 0x471   : > { %v1373_v48 = vadd.f32 %v2674_v25, %v1372_v30  ;;  %v3000_v26 = vpop.f32.mrb[18].mxu1 }
 0x472   : > { %v1384_v49 = vadd.f32 %v3000_v26, %v2674_v25  ;;  %v1375_v17 = vpop.f32.mrb[19].mxu1  ;;  %v1437_v5 = vmax.f32 %v1381_v47, 0.0 }
 0x473   : > { %v1376_v54 = vadd.f32 %v2674_v25, %v1375_v17  ;;  %v1435_v59 = vmax.f32 %v1373_v48, 0.0 }
 0x474   : > { %v1438_v58 = vmax.f32 %v1384_v49, 0.0 }
 0x475   : > { %v1436_v60 = vmax.f32 %v1376_v54, 0.0 }
 0x476   : > { %v1452_v62 = vpack.c.bf16 %v1438_v58, %v1437_v5 }
 0x477   : > { %v1451_v6 = vpack.c.bf16 %v1436_v60, %v1435_v59  ;;  %v3003_v23 = vpop.f32.mrb[20].mxu1 }
 0x478   : > { %v1397_v35 = vadd.f32 %v3003_v23, %v2674_v25  ;;  %v1388_v7 = vpop.f32.mrb[21].mxu1 }
 0x479   : > { %v1389_v31 = vadd.f32 %v2674_v25, %v1388_v7  ;;  %v3004_v22 = vpop.f32.mrb[22].mxu1  ;;  %3029 = vmatprep.mubr.bf16.mxu0 %v1451_v6 }
 0x47a   : > { %v1400_v8 = vadd.f32 %v3004_v22, %v2674_v25  ;;  %v1391_v36 = vpop.f32.mrb[23].mxu1  ;;  %3030 = vmatmul.mubr.bf16.vlgmr.msra.gmra.mrb[32].mxu0 %v1452_v62  ;;  %v1441_v21 = vmax.f32 %v1397_v35, 0.0 }
 0x47b   : > { %v1392_v20 = vadd.f32 %v2674_v25, %v1391_v36  ;;  %v1439_v27 = vmax.f32 %v1389_v31, 0.0 }
 0x47c   : > { %v1442_v45 = vmax.f32 %v1400_v8, 0.0 }
 0x47d   : > { %v1440_v33 = vmax.f32 %v1392_v20, 0.0 }
 0x47e   : > { %v1454_v37 = vpack.c.bf16 %v1442_v45, %v1441_v21 }
 0x47f   : > { %v1453_v40 = vpack.c.bf16 %v1440_v33, %v1439_v27  ;;  %v3007_v41 = vpop.f32.mrb[24].mxu1  ;;  %v3348_v33 = vld [vmem:[#allocation8 + $0x70] sm:$0xff]  }
 0x480   : > { %v1413_v29 = vadd.f32 %v3007_v41, %v2674_v25  ;;  %v1404_v43 = vpop.f32.mrb[25].mxu1  ;;  %3057 = vmatprep.subr.bf16.mxu1 %v3348_v33  ;;  %v3351_v41 = vld [vmem:[#allocation10 + $0x8] sm:$0xff]  }
 0x481   : > { %v1405_v44 = vadd.f32 %v2674_v25, %v1404_v43  ;;  %v3008_v47 = vpop.f32.mrb[26].mxu1  ;;  %3033 = vmatprep.mubr.bf16.mxu0 %v1453_v40  ;;  %3058 = vmatpush3.bf16.msra.mxu1 %v3348_v33  ;;  %v3350_v40 = vld [vmem:[#allocation10] sm:$0xff]  }
 0x482   : > { %v1416_v30 = vadd.f32 %v3008_v47, %v2674_v25  ;;  %v1407_v48 = vpop.f32.mrb[27].mxu1  ;;  %3034 = vmatmul.mubr.bf16.gmra.mrb[36].mxu0 %v1454_v37  ;;  %v1445_v49 = vmax.f32 %v1413_v29, 0.0  ;;  %v3349_v37 = vld [vmem:[#allocation8 + $0x78] sm:$0xff]   ;;  %3077 = vmatprep.subr.bf16.mxu0 %v3350_v40  ;;  %v2684_v43 = vld [vmem:[%s4493_s4 + $0x1] ss:$0 sm:$0xff] }
 0x483   : > { %v1408_v26 = vadd.f32 %v2674_v25, %v1407_v48  ;;  %v1443_v54 = vmax.f32 %v1405_v44, 0.0  ;;  %3059 = vmatprep.subr.bf16.mxu1 %v3349_v37  ;;  %3078 = vmatpush3.bf16.msra.mxu0 %v3350_v40  ;;  %v3353_v29 = vld [vmem:[#allocation10 + $0x18] sm:$0xff]  }
 0x484   : > { %v1446_v17 = vmax.f32 %v1416_v30, 0.0  ;;  %3079 = vmatprep.subr.bf16.mxu0 %v3351_v41 }
 0x485   : > { %v1444_v5 = vmax.f32 %v1408_v26, 0.0  ;;  %3060 = vmatpush3.bf16.msra.mxu1 %v3349_v37 }
 0x486   : > { %v1456_v58 = vpack.c.bf16 %v1446_v17, %v1445_v49 }
 0x487   : > { %v1455_v59 = vpack.c.bf16 %v1444_v5, %v1443_v54  ;;  %v3011_v60 = vpop.f32.mrb[28].mxu1  ;;  %3080 = vmatpush3.bf16.msra.mxu0 %v3351_v41 }
 0x488   : > { %v1429_v62 = vadd.f32 %v3011_v60, %v2674_v25  ;;  %v1420_v6 = vpop.f32.mrb[29].mxu1 }
 0x489   : > { %v1421_v23 = vadd.f32 %v2674_v25, %v1420_v6  ;;  %v3012_v35 = vpop.f32.mrb[30].mxu1  ;;  %3037 = vmatprep.mubr.bf16.mxu0 %v1455_v59 }
 0x48a   : > { %v1432_v7 = vadd.f32 %v3012_v35, %v2674_v25  ;;  %v1423_v31 = vpop.f32.mrb[31].mxu1  ;;  %3038 = vmatmul.mubr.bf16.gmra.mrb[40].mxu0 %v1456_v58  ;;  %v1449_v8 = vmax.f32 %v1429_v62, 0.0 }
 0x48b   : > { %v1424_v22 = vadd.f32 %v2674_v25, %v1423_v31  ;;  %v1447_v20 = vmax.f32 %v1421_v23, 0.0  ;;  %v3352_v25 = vld [vmem:[#allocation10 + $0x10] sm:$0xff]  }
 0x48c   : > { %v1450_v36 = vmax.f32 %v1432_v7, 0.0  ;;  %3081 = vmatprep.subr.bf16.mxu0 %v3352_v25 }
 0x48d   : > { %v1448_v21 = vmax.f32 %v1424_v22, 0.0  ;;  %3082 = vmatpush3.bf16.msra.mxu0 %v3352_v25 }
 0x48e   : > { %v1458_v45 = vpack.c.bf16 %v1450_v36, %v1449_v8  ;;  %3083 = vmatprep.subr.bf16.mxu0 %v3353_v29 }
 0x48f   : > { %v1457_v27 = vpack.c.bf16 %v1448_v21, %v1447_v20 }
 0x491   : > { %3041 = vmatprep.mubr.bf16.mxu0 %v1457_v27  ;;  %3084 = vmatpush3.bf16.msra.mxu0 %v3353_v29 }
 0x492   : > { %3042 = vmatmul.mubr.bf16.gmra.mrb[44].mxu0 %v1458_v45 }
 0x54d   : > { %v3031_v44 = vpop.f32.mrb[32].mxu0 }
 0x54e   : > { %v1575_v47 = vadd.f32 %v3031_v44, %v2684_v43  ;;  %v1566_v30 = vpop.f32.mrb[33].mxu0 }
 0x54f   : > { %v1567_v48 = vadd.f32 %v2684_v43, %v1566_v30  ;;  %v3032_v26 = vpop.f32.mrb[34].mxu0 }
 0x550   : > { %v1578_v49 = vadd.f32 %v3032_v26, %v2684_v43  ;;  %v1569_v17 = vpop.f32.mrb[35].mxu0  ;;  %v1631_v5 = vmax.f32 %v1575_v47, 0.0 }
 0x551   : > { %v1570_v54 = vadd.f32 %v2684_v43, %v1569_v17  ;;  %v1629_v59 = vmax.f32 %v1567_v48, 0.0 }
 0x552   : > { %v1632_v58 = vmax.f32 %v1578_v49, 0.0 }
 0x553   : > { %v1630_v60 = vmax.f32 %v1570_v54, 0.0 }
 0x554   : > { %v1646_v62 = vpack.c.bf16 %v1632_v58, %v1631_v5 }
 0x555   : > { %v1645_v6 = vpack.c.bf16 %v1630_v60, %v1629_v59  ;;  %v3035_v23 = vpop.f32.mrb[36].mxu0 }
 0x556   : > { %v1591_v35 = vadd.f32 %v3035_v23, %v2684_v43  ;;  %v1582_v7 = vpop.f32.mrb[37].mxu0 }
 0x557   : > { %v1583_v31 = vadd.f32 %v2684_v43, %v1582_v7  ;;  %v3036_v22 = vpop.f32.mrb[38].mxu0  ;;  %3061 = vmatprep.mubr.bf16.mxu1 %v1645_v6 }
 0x558   : > { %v1594_v8 = vadd.f32 %v3036_v22, %v2684_v43  ;;  %v1585_v36 = vpop.f32.mrb[39].mxu0  ;;  %3062 = vmatmul.mubr.bf16.vlgmr.msra.gmra.mrb[32].mxu1 %v1646_v62  ;;  %v1635_v21 = vmax.f32 %v1591_v35, 0.0 }
 0x559   : > { %v1586_v20 = vadd.f32 %v2684_v43, %v1585_v36  ;;  %v1633_v27 = vmax.f32 %v1583_v31, 0.0 }
 0x55a   : > { %v1636_v45 = vmax.f32 %v1594_v8, 0.0 }
 0x55b   : > { %v1634_v33 = vmax.f32 %v1586_v20, 0.0 }
 0x55c   : > { %v1648_v37 = vpack.c.bf16 %v1636_v45, %v1635_v21 }
 0x55d   : > { %v1647_v40 = vpack.c.bf16 %v1634_v33, %v1633_v27  ;;  %v3039_v41 = vpop.f32.mrb[40].mxu0  ;;  %v3354_v33 = vld [vmem:[#allocation10 + $0x20] sm:$0xff]  }
 0x55e   : > { %v1607_v25 = vadd.f32 %v3039_v41, %v2684_v43  ;;  %v1598_v29 = vpop.f32.mrb[41].mxu0  ;;  %3085 = vmatprep.subr.bf16.mxu0 %v3354_v33  ;;  %v3357_v41 = vld [vmem:[#allocation10 + $0x38] sm:$0xff]  }
 0x55f   : > { %v1599_v44 = vadd.f32 %v2684_v43, %v1598_v29  ;;  %v3040_v47 = vpop.f32.mrb[42].mxu0  ;;  %3065 = vmatprep.mubr.bf16.mxu1 %v1647_v40  ;;  %3086 = vmatpush3.bf16.msra.mxu0 %v3354_v33  ;;  %v3356_v40 = vld [vmem:[#allocation10 + $0x30] sm:$0xff]  }
 0x560   : > { %v1610_v30 = vadd.f32 %v3040_v47, %v2684_v43  ;;  %v1601_v48 = vpop.f32.mrb[43].mxu0  ;;  %3066 = vmatmul.mubr.bf16.gmra.mrb[36].mxu1 %v1648_v37  ;;  %v1639_v49 = vmax.f32 %v1607_v25, 0.0  ;;  %v3355_v37 = vld [vmem:[#allocation10 + $0x28] sm:$0xff]   ;;  %v3360_v29 = vld [vmem:[#allocation11 + $0x10] sm:$0xff]   ;;  %v3362_v47 = vld [vmem:[#allocation11 + $0x20] sm:$0xff]  }
 0x561   : > { %v1602_v26 = vadd.f32 %v2684_v43, %v1601_v48  ;;  %v1637_v54 = vmax.f32 %v1599_v44, 0.0  ;;  %3087 = vmatprep.subr.bf16.mxu0 %v3355_v37  ;;  %v3359_v25 = vld [vmem:[#allocation11 + $0x8] sm:$0xff]   ;;  %v3361_v44 = vld [vmem:[#allocation11 + $0x18] sm:$0xff]   ;;  %v4281_v48 = vld [vmem:[%s4539_s22 + $0x1] ss:$0 sm:$0xff] }
 0x562   : > { %v1640_v17 = vmax.f32 %v1610_v30, 0.0  ;;  %v3363_v30 = vld [vmem:[#allocation11 + $0x28] sm:$0xff]  }
 0x563   : > { %v1638_v5 = vmax.f32 %v1602_v26, 0.0  ;;  %3088 = vmatpush3.bf16.msra.mxu0 %v3355_v37 }
 0x564   : > { %v1650_v58 = vpack.c.bf16 %v1640_v17, %v1639_v49  ;;  %3089 = vmatprep.subr.bf16.mxu0 %v3356_v40 }
 0x565   : > { %v1649_v59 = vpack.c.bf16 %v1638_v5, %v1637_v54  ;;  %v3043_v60 = vpop.f32.mrb[44].mxu0  ;;  %v4287_v54 = vld [vmem:[%s4540_s10 + $0x1] ss:$0 sm:$0xff] }
 0x566   : > { %v1623_v62 = vadd.f32 %v3043_v60, %v2684_v43  ;;  %v1614_v6 = vpop.f32.mrb[45].mxu0 }
 0x567   : > { %v1615_v23 = vadd.f32 %v2684_v43, %v1614_v6  ;;  %v3044_v35 = vpop.f32.mrb[46].mxu0  ;;  %3069 = vmatprep.mubr.bf16.mxu1 %v1649_v59  ;;  %3090 = vmatpush3.bf16.msra.mxu0 %v3356_v40  ;;  %v4296_v6 = vld [vmem:[%s4541_s25 + $0x1] ss:$0 sm:$0xff] }
 0x568   : > { %v1626_v7 = vadd.f32 %v3044_v35, %v2684_v43  ;;  %v1617_v31 = vpop.f32.mrb[47].mxu0  ;;  %3070 = vmatmul.mubr.bf16.gmra.mrb[40].mxu1 %v1650_v58  ;;  %v1643_v8 = vmax.f32 %v1623_v62, 0.0  ;;  %3091 = vmatprep.subr.bf16.mxu0 %v3357_v41 }
 0x569   : > { %v1618_v22 = vadd.f32 %v2684_v43, %v1617_v31  ;;  %v1641_v20 = vmax.f32 %v1615_v23, 0.0  ;;  %v3358_v43 = vld [vmem:[#allocation11] sm:$0xff]  }
 0x56a   : > { %v1644_v36 = vmax.f32 %v1626_v7, 0.0  ;;  %3109 = vmatprep.subr.bf16.mxu1 %v3358_v43 }
 0x56b   : > { %v1642_v21 = vmax.f32 %v1618_v22, 0.0  ;;  %3092 = vmatpush3.bf16.msra.mxu0 %v3357_v41  ;;  %3110 = vmatpush3.bf16.msra.mxu1 %v3358_v43 }
 0x56c   : > { %v1652_v45 = vpack.c.bf16 %v1644_v36, %v1643_v8  ;;  %3111 = vmatprep.subr.bf16.mxu1 %v3359_v25 }
 0x56d   : > { %v1651_v27 = vpack.c.bf16 %v1642_v21, %v1641_v20 }
 0x56f   : > { %3073 = vmatprep.mubr.bf16.mxu1 %v1651_v27  ;;  %3112 = vmatpush3.bf16.msra.mxu1 %v3359_v25 }
 0x570   : > { %3074 = vmatmul.mubr.bf16.gmra.mrb[44].mxu1 %v1652_v45  ;;  %3113 = vmatprep.subr.bf16.mxu1 %v3360_v29 }
 0x573   : > { %3114 = vmatpush3.bf16.msra.mxu1 %v3360_v29 }
 0x574   : > { %3115 = vmatprep.subr.bf16.mxu1 %v3361_v44 }
 0x577   : > { %3116 = vmatpush3.bf16.msra.mxu1 %v3361_v44 }
 0x578   : > { %3117 = vmatprep.subr.bf16.mxu1 %v3362_v47 }
 0x57b   : > { %3118 = vmatpush3.bf16.msra.mxu1 %v3362_v47 }
 0x57c   : > { %3119 = vmatprep.subr.bf16.mxu1 %v3363_v30 }
 0x57f   : > { %3120 = vmatpush3.bf16.msra.mxu1 %v3363_v30 }
 0x62b   : > { %v3063_v26 = vpop.f32.mrb[32].mxu1 }
 0x62c   : > { %v1769_v49 = vadd.f32 %v3063_v26, %v4281_v48  ;;  %v1760_v17 = vpop.f32.mrb[33].mxu1 }
 0x62d   : > { %v1761_v5 = vadd.f32 %v4281_v48, %v1760_v17  ;;  %v3064_v58 = vpop.f32.mrb[34].mxu1 }
 0x62e   : > { %v1825_v59 = vadd.f32 %v1769_v49, %v1243_v1  ;;  %v1772_v60 = vadd.f32 %v3064_v58, %v4281_v48  ;;  %v1763_v62 = vpop.f32.mrb[35].mxu1 }
 0x62f   : > { %v1823_v23 = vadd.f32 %v1761_v5, %v1241_v63  ;;  %v1764_v35 = vadd.f32 %v4281_v48, %v1763_v62 }
 0x630   : > { %v1849_v7 = vadd.f32 %v4287_v54, %v1825_v59  ;;  %v1826_v31 = vadd.f32 %v1772_v60, %v1244_v57 }
 0x631   : > { %v1847_v52 = vadd.f32 %v4287_v54, %v1823_v23  ;;  %v1824_v1 = vadd.f32 %v1764_v35, %v1242_v0 }
 0x632   : > { %v1873_v22 = vmul.f32 %v4296_v6, %v1849_v7  ;;  %v1850_v8 = vadd.f32 %v4287_v54, %v1826_v31 }
 0x633   : > { %v1848_v36 = vadd.f32 %v4287_v54, %v1824_v1  ;;  %v3067_v51 = vpop.f32.mrb[36].mxu1  ;;  %v1871_v63 = vmul.f32 %v4296_v6, %v1847_v52 }
 0x634   : > { %v1874_v20 = vmul.f32 %v4296_v6, %v1850_v8  ;;  %v1785_v21 = vadd.f32 %v3067_v51, %v4281_v48  ;;  %v1776_v53 = vpop.f32.mrb[37].mxu1  ;;  %v1889_v0 = vmax.f32 %v1873_v22, 0.0 }
 0x635   : > { %v1777_v57 = vadd.f32 %v4281_v48, %v1776_v53  ;;  %v3068_v45 = vpop.f32.mrb[38].mxu1  ;;  %v1872_v56 = vmul.f32 %v4296_v6, %v1848_v36  ;;  %v1887_v25 = vmax.f32 %v1871_v63, 0.0 }
 0x636   : > { %v1890_v27 = vmax.f32 %v1874_v20, 0.0  ;;  %v1829_v33 = vadd.f32 %v1785_v21, %v1247_v42  ;;  %v1788_v37 = vadd.f32 %v3068_v45, %v4281_v48  ;;  %v1779_v40 = vpop.f32.mrb[39].mxu1 }
 0x637   : > { %v1827_v41 = vadd.f32 %v1777_v57, %v1245_v38  ;;  %v1780_v43 = vadd.f32 %v4281_v48, %v1779_v40  ;;  %v1888_v29 = vmax.f32 %v1872_v56, 0.0 }
 0x638   : > { %v1904_v44 = vpack.c.bf16 %v1890_v27, %v1889_v0  ;;  %v1853_v47 = vadd.f32 %v4287_v54, %v1829_v33  ;;  %v1830_v30 = vadd.f32 %v1788_v37, %v1248_v28 }
 0x639   : > { %v1851_v26 = vadd.f32 %v4287_v54, %v1827_v41  ;;  %v1828_v12 = vadd.f32 %v1780_v43, %v1246_v39  ;;  %v1903_v42 = vpack.c.bf16 %v1888_v29, %v1887_v25 }
 0x63a   : > { %v1854_v49 = vadd.f32 %v4287_v54, %v1830_v30  ;;  %v1877_v24 = vmul.f32 %v4296_v6, %v1853_v47 }
 0x63b   : > { %v1852_v38 = vadd.f32 %v4287_v54, %v1828_v12  ;;  %v3071_v17 = vpop.f32.mrb[40].mxu1  ;;  %3093 = vmatprep.mubr.bf16.mxu0 %v1903_v42  ;;  %v1875_v5 = vmul.f32 %v4296_v6, %v1851_v26 }
 0x63c   : > { %v1801_v58 = vadd.f32 %v3071_v17, %v4281_v48  ;;  %v1792_v61 = vpop.f32.mrb[41].mxu1  ;;  %3094 = vmatmul.mubr.bf16.vlgmr.msra.gmra.mrb[48].mxu0 %v1904_v44  ;;  %v1878_v28 = vmul.f32 %v4296_v6, %v1854_v49  ;;  %v1893_v35 = vmax.f32 %v1877_v24, 0.0  ;;  %v3366_v17 = vld [vmem:[#allocation13] sm:$0xff]  }
 0x63d   : > { %v1793_v15 = vadd.f32 %v4281_v48, %v1792_v61  ;;  %v3072_v39 = vpop.f32.mrb[42].mxu1  ;;  %v1876_v59 = vmul.f32 %v4296_v6, %v1852_v38  ;;  %v1891_v1 = vmax.f32 %v1875_v5, 0.0  ;;  %v3364_v38 = vld [vmem:[#allocation11 + $0x30] sm:$0xff]   ;;  %v3367_v5 = vld [vmem:[#allocation13 + $0x8] sm:$0xff]   ;;  %3141 = vmatprep.subr.bf16.mxu0 %v3366_v17  ;;  %v4376_v61 = vld [vmem:[#allocation13 + $0x20] sm:$0xff]  }
 0x63e   : > { %v1833_v60 = vadd.f32 %v1801_v58, %v1251_v18  ;;  %v1804_v62 = vadd.f32 %v3072_v39, %v4281_v48  ;;  %v1795_v23 = vpop.f32.mrb[43].mxu1  ;;  %v1894_v7 = vmax.f32 %v1878_v28, 0.0  ;;  %3121 = vmatprep.subr.bf16.mxu1 %v3364_v38  ;;  %3142 = vmatpush3.bf16.msra.mxu0 %v3366_v17  ;;  %v4373_v58 = vld [vmem:[#allocation13 + $0x18] sm:$0xff]   ;;  %v4380_v28 = vld [vmem:[#allocation13 + $0x28] sm:$0xff]  }
 0x63f   : > { %v1831_v31 = vadd.f32 %v1793_v15, %v1249_v2  ;;  %v1796_v52 = vadd.f32 %v4281_v48, %v1795_v23  ;;  %v1892_v22 = vmax.f32 %v1876_v59, 0.0  ;;  %3122 = vmatpush3.bf16.msra.mxu1 %v3364_v38  ;;  %3143 = vmatprep.subr.bf16.mxu0 %v3367_v5  ;;  %v4388_v15 = vld [vmem:[%s4542_s28] ss:$0 sm:$0xff] }
 0x640   : > { %v1857_v8 = vadd.f32 %v4287_v54, %v1833_v60  ;;  %v1834_v36 = vadd.f32 %v1804_v62, %v1252_v46  ;;  %v1906_v51 = vpack.c.bf16 %v1894_v7, %v1893_v35 }
 0x641   : > { %v1855_v50 = vadd.f32 %v4287_v54, %v1831_v31  ;;  %v1832_v18 = vadd.f32 %v1796_v52, %v1250_v3  ;;  %v1905_v63 = vpack.c.bf16 %v1892_v22, %v1891_v1 }
 0x642   : > { %v1858_v20 = vadd.f32 %v4287_v54, %v1834_v36  ;;  %v1881_v16 = vmul.f32 %v4296_v6, %v1857_v8  ;;  %3144 = vmatpush3.bf16.msra.mxu0 %v3367_v5 }
 0x643   : > { %v1856_v2 = vadd.f32 %v4287_v54, %v1832_v18  ;;  %v3075_v21 = vpop.f32.mrb[44].mxu1  ;;  %3097 = vmatprep.mubr.bf16.mxu0 %v1905_v63  ;;  %v1879_v53 = vmul.f32 %v4296_v6, %v1855_v50 }
 0x644   : > { %v1817_v4 = vadd.f32 %v3075_v21, %v4281_v48  ;;  %v1808_v46 = vpop.f32.mrb[45].mxu1  ;;  %3098 = vmatmul.mubr.bf16.gmra.mrb[52].mxu0 %v1906_v51  ;;  %v1882_v57 = vmul.f32 %v4296_v6, %v1858_v20  ;;  %v1897_v33 = vmax.f32 %v1881_v16, 0.0 }
 0x645   : > { %v1809_v55 = vadd.f32 %v4281_v48, %v1808_v46  ;;  %v3076_v3 = vpop.f32.mrb[46].mxu1  ;;  %v1880_v45 = vmul.f32 %v4296_v6, %v1856_v2  ;;  %v1895_v43 = vmax.f32 %v1879_v53, 0.0 }
 0x646   : > { %v1837_v56 = vadd.f32 %v1817_v4, %v1255_v14  ;;  %v1820_v0 = vadd.f32 %v3076_v3, %v4281_v48  ;;  %v1811_v27 = vpop.f32.mrb[47].mxu1  ;;  %v1898_v37 = vmax.f32 %v1882_v57, 0.0 }
 0x647   : > { %v1835_v40 = vadd.f32 %v1809_v55, %v1253_v13  ;;  %v1812_v41 = vadd.f32 %v4281_v48, %v1811_v27  ;;  %v1896_v25 = vmax.f32 %v1880_v45, 0.0 }
 0x648   : > { %v1861_v29 = vadd.f32 %v4287_v54, %v1837_v56  ;;  %v1838_v44 = vadd.f32 %v1820_v0, %v1256_v11  ;;  %v1908_v47 = vpack.c.bf16 %v1898_v37, %v1897_v33 }
 0x649   : > { %v1859_v32 = vadd.f32 %v4287_v54, %v1835_v40  ;;  %v1836_v14 = vadd.f32 %v1812_v41, %v1254_v34  ;;  %v1907_v30 = vpack.c.bf16 %v1896_v25, %v1895_v43 }
 0x64a   : > { %v1862_v26 = vadd.f32 %v4287_v54, %v1838_v44  ;;  %v1885_v9 = vmul.f32 %v4296_v6, %v1861_v29 }
 0x64b   : > { %v1860_v13 = vadd.f32 %v4287_v54, %v1836_v14  ;;  %3101 = vmatprep.mubr.bf16.mxu0 %v1907_v30  ;;  %v1883_v48 = vmul.f32 %v4296_v6, %v1859_v32  ;;  %v3365_v54 = vld [vmem:[#allocation11 + $0x38] sm:$0xff]  }
 0x64c   : > { %3102 = vmatmul.mubr.bf16.gmra.mrb[56].mxu0 %v1908_v47  ;;  %v1886_v10 = vmul.f32 %v4296_v6, %v1862_v26  ;;  %v1901_v12 = vmax.f32 %v1885_v9, 0.0  ;;  %3123 = vmatprep.subr.bf16.mxu1 %v3365_v54 }
 0x64d   : > { %v1884_v11 = vmul.f32 %v4296_v6, %v1860_v13  ;;  %v1899_v49 = vmax.f32 %v1883_v48, 0.0  ;;  %3124 = vmatpush3.bf16.msra.mxu1 %v3365_v54  ;;  %v3368_v6 = vld [vmem:[#allocation13 + $0x10] sm:$0xff]  }
 0x64e   : > { %v1902_v42 = vmax.f32 %v1886_v10, 0.0  ;;  %3173 = vmatprep.subr.bf16.mxu1 %v3366_v17  ;;  %3145 = vmatprep.subr.bf16.mxu0 %v3368_v6  ;;  %v3372_v54 = vld [vmem:[#allocation13 + $0x30] sm:$0xff]  }
 0x64f   : > { %v1900_v19 = vmax.f32 %v1884_v11, 0.0  ;;  %3146 = vmatpush3.bf16.msra.mxu0 %v3368_v6 }
 0x650   : > { %v1910_v34 = vpack.c.bf16 %v1902_v42, %v1901_v12  ;;  %3147 = vmatprep.subr.bf16.mxu0 %v4373_v58 }
 0x651   : > { %v1909_v24 = vpack.c.bf16 %v1900_v19, %v1899_v49 }
 0x653   : > { %3105 = vmatprep.mubr.bf16.mxu0 %v1909_v24  ;;  %3148 = vmatpush3.bf16.msra.mxu0 %v4373_v58 }
 0x654   : > { %3106 = vmatmul.mubr.bf16.gmra.mrb[60].mxu0 %v1910_v34  ;;  %3149 = vmatprep.subr.bf16.mxu0 %v4376_v61 }
 0x657   : > { %3150 = vmatpush3.bf16.msra.mxu0 %v4376_v61 }
 0x658   : > { %3151 = vmatprep.subr.bf16.mxu0 %v4380_v28 }
 0x65b   : > { %3152 = vmatpush3.bf16.msra.mxu0 %v4380_v28 }
 0x65c   : > { %3153 = vmatprep.subr.bf16.mxu0 %v3372_v54 }
 0x65f   : > { %3154 = vmatpush3.bf16.msra.mxu0 %v3372_v54 }
 0x70f   : > { %v3095_v39 = vpop.f32.mrb[48].mxu0 }
 0x710   : > { %v2025_v59 = vadd.f32 %v3095_v39, %v4388_v15  ;;  %v2016_v60 = vpop.f32.mrb[49].mxu0 }
 0x711   : > { %v2017_v62 = vadd.f32 %v4388_v15, %v2016_v60  ;;  %v3096_v23 = vpop.f32.mrb[50].mxu0 }
 0x712   : > { %v2028_v35 = vadd.f32 %v3096_v23, %v4388_v15  ;;  %v2019_v7 = vpop.f32.mrb[51].mxu0  ;;  %v2081_v52 = vmax.f32 %v2025_v59, 0.0 }
 0x713   : > { %v2020_v31 = vadd.f32 %v4388_v15, %v2019_v7  ;;  %v2079_v22 = vmax.f32 %v2017_v62, 0.0 }
 0x714   : > { %v2082_v1 = vmax.f32 %v2028_v35, 0.0 }
 0x715   : > { %v2080_v8 = vmax.f32 %v2020_v31, 0.0 }
 0x716   : > { %v2096_v36 = vpack.c.bf16 %v2082_v1, %v2081_v52 }
 0x717   : > { %v2095_v51 = vpack.c.bf16 %v2080_v8, %v2079_v22  ;;  %v3099_v50 = vpop.f32.mrb[52].mxu0 }
 0x718   : > { %v2041_v18 = vadd.f32 %v3099_v50, %v4388_v15  ;;  %v2032_v63 = vpop.f32.mrb[53].mxu0 }
 0x719   : > { %v2033_v20 = vadd.f32 %v4388_v15, %v2032_v63  ;;  %v3100_v16 = vpop.f32.mrb[54].mxu0  ;;  %3125 = vmatprep.mubr.bf16.mxu1 %v2095_v51 }
 0x71a   : > { %v2044_v2 = vadd.f32 %v3100_v16, %v4388_v15  ;;  %v2035_v21 = vpop.f32.mrb[55].mxu0  ;;  %3126 = vmatmul.mubr.bf16.vlgmr.msra.gmra.mrb[48].mxu1 %v2096_v36  ;;  %v2085_v4 = vmax.f32 %v2041_v18, 0.0 }
 0x71b   : > { %v2036_v53 = vadd.f32 %v4388_v15, %v2035_v21  ;;  %3181 = vmatpush3.bf16.msra.mxu1 %v3366_v17  ;;  %v2083_v57 = vmax.f32 %v2033_v20, 0.0  ;;  %v3373_v17 = vld [vmem:[#allocation13 + $0x38] sm:$0xff]  }
 0x71c   : > { %v2086_v46 = vmax.f32 %v2044_v2, 0.0  ;;  %3174 = vmatprep.subr.bf16.mxu1 %v3367_v5  ;;  %3155 = vmatprep.subr.bf16.mxu0 %v3373_v17 }
 0x71d   : > { %v2084_v55 = vmax.f32 %v2036_v53, 0.0  ;;  %3156 = vmatpush3.bf16.msra.mxu0 %v3373_v17 }
 0x71e   : > { %v2098_v3 = vpack.c.bf16 %v2086_v46, %v2085_v4 }
 0x71f   : > { %v2097_v45 = vpack.c.bf16 %v2084_v55, %v2083_v57  ;;  %v3103_v56 = vpop.f32.mrb[56].mxu0  ;;  %3182 = vmatpush3.bf16.msra.mxu1 %v3367_v5  ;;  %v2716_v5 = vld [vmem:[%s4543_s1] ss:$0 sm:$0xff]  ;;  %s4440_s1 = scalar_lea.hbm %s4545_s29, %s2740_s27 }
 0x720   : > { %v2057_v0 = vadd.f32 %v3103_v56, %v4388_v15  ;;  %v2048_v27 = vpop.f32.mrb[57].mxu0  ;;  %3175 = vmatprep.subr.bf16.mxu1 %v3368_v6 }
 0x721   : > { %v2049_v33 = vadd.f32 %v4388_v15, %v2048_v27  ;;  %v3104_v37 = vpop.f32.mrb[58].mxu0  ;;  %3129 = vmatprep.mubr.bf16.mxu1 %v2097_v45 }
 0x722   : > { %v2060_v40 = vadd.f32 %v3104_v37, %v4388_v15  ;;  %v2051_v41 = vpop.f32.mrb[59].mxu0  ;;  %3130 = vmatmul.mubr.bf16.gmra.mrb[52].mxu1 %v2098_v3  ;;  %v2089_v25 = vmax.f32 %v2057_v0, 0.0 }
 0x723   : > { %v2052_v43 = vadd.f32 %v4388_v15, %v2051_v41  ;;  %3183 = vmatpush3.bf16.msra.mxu1 %v3368_v6  ;;  %v2087_v44 = vmax.f32 %v2049_v33, 0.0 }
 0x724   : > { %v2090_v29 = vmax.f32 %v2060_v40, 0.0  ;;  %3176 = vmatprep.subr.bf16.mxu1 %v4373_v58 }
 0x725   : > { %v2088_v47 = vmax.f32 %v2052_v43, 0.0 }
 0x726   : > { %v2100_v32 = vpack.c.bf16 %v2090_v29, %v2089_v25 }
 0x727   : > { %v2099_v14 = vpack.c.bf16 %v2088_v47, %v2087_v44  ;;  %v3107_v30 = vpop.f32.mrb[60].mxu0  ;;  %3184 = vmatpush3.bf16.msra.mxu1 %v4373_v58 }
 0x728   : > { %v2073_v26 = vadd.f32 %v3107_v30, %v4388_v15  ;;  %v2064_v9 = vpop.f32.mrb[61].mxu0  ;;  %3177 = vmatprep.subr.bf16.mxu1 %v4376_v61 }
 0x729   : > { %v2065_v13 = vadd.f32 %v4388_v15, %v2064_v9  ;;  %v3108_v48 = vpop.f32.mrb[62].mxu0  ;;  %3133 = vmatprep.mubr.bf16.mxu1 %v2099_v14 }
 0x72a   : > { %v2076_v10 = vadd.f32 %v3108_v48, %v4388_v15  ;;  %v2067_v11 = vpop.f32.mrb[63].mxu0  ;;  %3134 = vmatmul.mubr.bf16.gmra.mrb[56].mxu1 %v2100_v32  ;;  %v2093_v42 = vmax.f32 %v2073_v26, 0.0 }
 0x72b   : > { %v2068_v12 = vadd.f32 %v4388_v15, %v2067_v11  ;;  %3185 = vmatpush3.bf16.msra.mxu1 %v4376_v61  ;;  %v2091_v19 = vmax.f32 %v2065_v13, 0.0 }
 0x72c   : > { %v2094_v49 = vmax.f32 %v2076_v10, 0.0  ;;  %3178 = vmatprep.subr.bf16.mxu1 %v4380_v28 }
 0x72d   : > { %v2092_v34 = vmax.f32 %v2068_v12, 0.0 }
 0x72e   : > { %v2102_v24 = vpack.c.bf16 %v2094_v49, %v2093_v42  ;;  %v2725_v49 = vld [vmem:[%s4544_s15] ss:$0 sm:$0xff]  ;;  %s3576_s15 = sshll.u32 %s3663_s23, 4  ;;  %s3577_s15 = int_to_ptr.vmem [resolvable:$false] %s3576_s15 }
 0x72f   : > { %v2101_v38 = vpack.c.bf16 %v2092_v34, %v2091_v19  ;;  %3186 = vmatpush3.bf16.msra.mxu1 %v4380_v28  ;;  %s3578_s27 = scalar_lea.vmem %s3577_s15, 4096  ;;  %p3579_p13 = scmp.lt.s32.totalorder %s4442_s8, %s3577_s15 }
 0x730   : > { %3179 = vmatprep.subr.bf16.mxu1 %v3372_v54  ;;  %p3580_p0 = scmp.lt.s32.totalorder %s3578_s27, %s3572_s12 }
 0x731   : > { %3137 = vmatprep.mubr.bf16.mxu1 %v2101_v38 }
 0x732   : > { %3138 = vmatmul.mubr.bf16.gmra.mrb[60].mxu1 %v2102_v24  ;;  %p3581_p2 = por %p3580_p0, %p3579_p13 }
 0x733   : > { %3187 = vmatpush3.bf16.msra.mxu1 %v3372_v54 }
 0x734   : > { %3180 = vmatprep.subr.bf16.mxu1 %v3373_v17  ;;  %p3582_p8 = pnand %p3581_p2, %p3575_p1 }
 0x737   : > { %3188 = vmatpush3.bf16.msra.mxu1 %v3373_v17 }
 0x7ed   : > { %v3127_v6 = vpop.f32.mrb[48].mxu1 }
 0x7ee   : > { %v2217_v58 = vadd.f32 %v3127_v6, %v2716_v5  ;;  %v2208_v61 = vpop.f32.mrb[49].mxu1 }
 0x7ef   : > { %v2209_v28 = vadd.f32 %v2716_v5, %v2208_v61  ;;  %v3128_v15 = vpop.f32.mrb[50].mxu1 }
 0x7f0   : > { %v2220_v39 = vadd.f32 %v3128_v15, %v2716_v5  ;;  %v2211_v59 = vpop.f32.mrb[51].mxu1  ;;  %v2273_v62 = vmax.f32 %v2217_v58, 0.0 }
 0x7f1   : > { %v2212_v60 = vadd.f32 %v2716_v5, %v2211_v59  ;;  %v2271_v35 = vmax.f32 %v2209_v28, 0.0 }
 0x7f2   : > { %v2274_v23 = vmax.f32 %v2220_v39, 0.0 }
 0x7f3   : > { %v2272_v7 = vmax.f32 %v2212_v60, 0.0 }
 0x7f4   : > { %v2288_v31 = vpack.c.bf16 %v2274_v23, %v2273_v62 }
 0x7f5   : > { %v2287_v52 = vpack.c.bf16 %v2272_v7, %v2271_v35  ;;  %v3131_v1 = vpop.f32.mrb[52].mxu1 }
 0x7f6   : > { %v2233_v22 = vadd.f32 %v3131_v1, %v2716_v5  ;;  %v2224_v8 = vpop.f32.mrb[53].mxu1 }
 0x7f7   : > { %v2225_v36 = vadd.f32 %v2716_v5, %v2224_v8  ;;  %v3132_v51 = vpop.f32.mrb[54].mxu1  ;;  %3157 = vmatprep.mubr.bf16.mxu0 %v2287_v52 }
 0x7f8   : > { %v2236_v50 = vadd.f32 %v3132_v51, %v2716_v5  ;;  %v2227_v18 = vpop.f32.mrb[55].mxu1  ;;  %3158 = vmatmul.mubr.bf16.vlgmr.msra.gmra.mrb[64].mxu0 %v2288_v31  ;;  %v2277_v20 = vmax.f32 %v2233_v22, 0.0 }
 0x7f9   : > { %v2228_v63 = vadd.f32 %v2716_v5, %v2227_v18  ;;  %v2275_v2 = vmax.f32 %v2225_v36, 0.0 }
 0x7fa   : > { %v2278_v16 = vmax.f32 %v2236_v50, 0.0 }
 0x7fb   : > { %v2276_v21 = vmax.f32 %v2228_v63, 0.0 }
 0x7fc   : > { %v2290_v53 = vpack.c.bf16 %v2278_v16, %v2277_v20 }
 0x7fd   : > { %v2289_v4 = vpack.c.bf16 %v2276_v21, %v2275_v2  ;;  %v3135_v46 = vpop.f32.mrb[56].mxu1 }
 0x7fe   : > { %v2249_v57 = vadd.f32 %v3135_v46, %v2716_v5  ;;  %v2240_v55 = vpop.f32.mrb[57].mxu1 }
 0x7ff   : > { %v2241_v3 = vadd.f32 %v2716_v5, %v2240_v55  ;;  %v3136_v45 = vpop.f32.mrb[58].mxu1  ;;  %3161 = vmatprep.mubr.bf16.mxu0 %v2289_v4 }
 0x800   : > { %v2252_v56 = vadd.f32 %v3136_v45, %v2716_v5  ;;  %v2243_v0 = vpop.f32.mrb[59].mxu1  ;;  %3162 = vmatmul.mubr.bf16.gmra.mrb[68].mxu0 %v2290_v53  ;;  %v2281_v33 = vmax.f32 %v2249_v57, 0.0 }
 0x801   : > { %v2244_v27 = vadd.f32 %v2716_v5, %v2243_v0  ;;  %v2279_v40 = vmax.f32 %v2241_v3, 0.0 }
 0x802   : > { %v2282_v37 = vmax.f32 %v2252_v56, 0.0 }
 0x803   : > { %v2280_v41 = vmax.f32 %v2244_v27, 0.0 }
 0x804   : > { %v2292_v43 = vpack.c.bf16 %v2282_v37, %v2281_v33 }
 0x805   : > { %v2291_v25 = vpack.c.bf16 %v2280_v41, %v2279_v40  ;;  %v3139_v29 = vpop.f32.mrb[60].mxu1 }
 0x806   : > { %v2265_v44 = vadd.f32 %v3139_v29, %v2716_v5  ;;  %v2256_v47 = vpop.f32.mrb[61].mxu1 }
 0x807   : > { %v2257_v32 = vadd.f32 %v2716_v5, %v2256_v47  ;;  %v3140_v14 = vpop.f32.mrb[62].mxu1  ;;  %3165 = vmatprep.mubr.bf16.mxu1 %v2291_v25 }
 0x808   : > { %v2268_v30 = vadd.f32 %v3140_v14, %v2716_v5  ;;  %v2259_v26 = vpop.f32.mrb[63].mxu1  ;;  %3166 = vmatmul.mubr.bf16.vlgmr.msra.gmra.mrb[64].mxu1 %v2292_v43  ;;  %v2285_v13 = vmax.f32 %v2265_v44, 0.0 }
 0x809   : > { %v2260_v9 = vadd.f32 %v2716_v5, %v2259_v26  ;;  %v2283_v10 = vmax.f32 %v2257_v32, 0.0 }
 0x80a   : > { %v2286_v48 = vmax.f32 %v2268_v30, 0.0 }
 0x80b   : > { %v2284_v11 = vmax.f32 %v2260_v9, 0.0 }
 0x80c   : > { %v2294_v12 = vpack.c.bf16 %v2286_v48, %v2285_v13 }
 0x80d   : > { %v2293_v42 = vpack.c.bf16 %v2284_v11, %v2283_v10 }
 0x80f   : > { %3169 = vmatprep.mubr.bf16.mxu1 %v2293_v42 }
 0x810   : > { %3170 = vmatmul.mubr.bf16.gmra.mrb[68].mxu1 %v2294_v12 }
 0x8cb   : > { %v3159_v19 = vpop.f32.mrb[64].mxu0 }
 0x8cc   : > { %v2409_v34 = vadd.f32 %v3159_v19, %v2725_v49  ;;  %v2400_v24 = vpop.f32.mrb[65].mxu0 }
 0x8cd   : > { %v2401_v38 = vadd.f32 %v2725_v49, %v2400_v24  ;;  %v3160_v54 = vpop.f32.mrb[66].mxu0 }
 0x8ce   : > { %2465 = vst [vmem:[%s4420_s16 + $0x10] sm:$0xff] %v2409_v34  ;;  %v2412_v17 = vadd.f32 %v3160_v54, %v2725_v49  ;;  %v2403_v5 = vpop.f32.mrb[67].mxu0 }
 0x8cf   : > { %2463 = vst [vmem:[%s4420_s16] sm:$0xff] %v2401_v38  ;;  %v2404_v6 = vadd.f32 %v2725_v49, %v2403_v5 }
 0x8d0   : > { %2466 = vst [vmem:[%s4420_s16 + $0x18] sm:$0xff] %v2412_v17 }
 0x8d1   : > { %2464 = vst [vmem:[%s4420_s16 + $0x8] sm:$0xff] %v2404_v6 }
 0x8d3   : > { %v3163_v58 = vpop.f32.mrb[68].mxu0 }
 0x8d4   : > { %v2425_v61 = vadd.f32 %v3163_v58, %v2725_v49  ;;  %v2416_v28 = vpop.f32.mrb[69].mxu0 }
 0x8d5   : > { %v2417_v15 = vadd.f32 %v2725_v49, %v2416_v28  ;;  %v3164_v39 = vpop.f32.mrb[70].mxu0 }
 0x8d6   : > { %2469 = vst [vmem:[%s4420_s16 + $0x30] sm:$0xff] %v2425_v61  ;;  %v2428_v59 = vadd.f32 %v3164_v39, %v2725_v49  ;;  %v2419_v60 = vpop.f32.mrb[71].mxu0 }
 0x8d7   : > { %2467 = vst [vmem:[%s4420_s16 + $0x20] sm:$0xff] %v2417_v15  ;;  %v2420_v62 = vadd.f32 %v2725_v49, %v2419_v60 }
 0x8d8   : > { %2470 = vst [vmem:[%s4420_s16 + $0x38] sm:$0xff] %v2428_v59 }
 0x8d9   : > { %2468 = vst [vmem:[%s4420_s16 + $0x28] sm:$0xff] %v2420_v62 }
 0x8db   : > { %v3167_v23 = vpop.f32.mrb[64].mxu1 }
 0x8dc   : > { %v2441_v35 = vadd.f32 %v3167_v23, %v2725_v49  ;;  %v2432_v7 = vpop.f32.mrb[65].mxu1 }
 0x8dd   : > { %v2433_v31 = vadd.f32 %v2725_v49, %v2432_v7  ;;  %v3168_v52 = vpop.f32.mrb[66].mxu1 }
 0x8de   : > { %2473 = vst [vmem:[%s4420_s16 + $0x50] sm:$0xff] %v2441_v35  ;;  %v2444_v1 = vadd.f32 %v3168_v52, %v2725_v49  ;;  %v2435_v22 = vpop.f32.mrb[67].mxu1 }
 0x8df   : > { %2471 = vst [vmem:[%s4420_s16 + $0x40] sm:$0xff] %v2433_v31  ;;  %v2436_v8 = vadd.f32 %v2725_v49, %v2435_v22 }
 0x8e0   : > { %2474 = vst [vmem:[%s4420_s16 + $0x58] sm:$0xff] %v2444_v1 }
 0x8e1   : > { %2472 = vst [vmem:[%s4420_s16 + $0x48] sm:$0xff] %v2436_v8 }
 0x8e3   : > { %v3171_v36 = vpop.f32.mrb[68].mxu1 }
 0x8e4   : > { %v2457_v51 = vadd.f32 %v3171_v36, %v2725_v49  ;;  %v2448_v50 = vpop.f32.mrb[69].mxu1 }
 0x8e5   : > { %v2449_v18 = vadd.f32 %v2725_v49, %v2448_v50  ;;  %v3172_v63 = vpop.f32.mrb[70].mxu1 }
 0x8e6   : > { %2477 = vst [vmem:[%s4420_s16 + $0x70] sm:$0xff] %v2457_v51  ;;  %v2460_v20 = vadd.f32 %v3172_v63, %v2725_v49  ;;  %v2451_v16 = vpop.f32.mrb[71].mxu1 }
 0x8e7   : > { %2475 = vst [vmem:[%s4420_s16 + $0x60] sm:$0xff] %v2449_v18  ;;  %v2452_v2 = vadd.f32 %v2725_v49, %v2451_v16 }
 0x8e8   : > { %2478 = vst [vmem:[%s4420_s16 + $0x78] sm:$0xff] %v2460_v20 }
 0x8e9   : > { %2476 = vst [vmem:[%s4420_s16 + $0x68] sm:$0xff] %v2452_v2 }
 0x8ea   : > { %3585 = shalt.err (!%p3582_p8)
}
 0x8eb   : > { %s3586_s16 = scalar_lea.hbm %s4440_s1, 2048  ;;  %s3590_s23 = scalar_lea.hbm %s4545_s29, 4096 }
 0x8ec   : > { %p3587_p4 = scmp.ne.s32.totalorder %s4440_s1, %s3586_s16  ;;  %p3591_p3 = scmp.lt.u32.totalorder %s4440_s1, %s4545_s29 }
 0x8ed   : > { %p3592_p5 = scmp.lt.u32.totalorder %s3590_s23, %s3586_s16  ;;  %p3594_p6 = scmp.lt.u32.totalorder %s3586_s16, %s4440_s1 }
 0x8ee   : > { %p3588_p10 = pnand %p3587_p4, %p4546_p9 }
 0x8ef   : > { %p3593_p7 = por %p3592_p5, %p3591_p3 }
 0x8f0   : > { %p3589_p11 = pneg %p3588_p10 }
 0x8f1   : > { %p3595_p12 = por %p3594_p6, %p3593_p7 }
 0x8f3   : > { %p3596_p1 = pnand %p3595_p12, %p3589_p11 }
 0x8f5   : > { %3599 = shalt.err (!%p3596_p1)
}
 0x8f6   : > { %s3664_s12 = smov 128   ;;  %s3665_s27 = smov 8  }
 0x8f7   : > { %s4547_s0 = scalar_lea.sflag [#allocation4], %s4019_s14 }
 0x8f8   : > { %3215 = dma.vmem_to_hbm [thread:$0]  (%p4546_p9), %s4442_s8, 2048, %s4440_s1, %s4547_s0, %s3664_s12, %s3664_s12, %s3665_s27  }
 0x8f9 PF: > { %s2508_s24 = sand.u32 1, %s3638_s18   ;;  %p4548_p13 = scmp.ne.s32.totalorder %s4529_s17, 0 }
 0x8fa   : > { %p4549_p0 = scmp.ge.s32.totalorder %s3650_s21, 2  ;;  %s2509_s16 = scalar_lea.sflag [#allocation4], %s2508_s24 }
 0x8fc   : > { %p3241_p2 = pnand %p4549_p0, %p4548_p13 }
 0x8fe   : > { %3633 = dma.done.wait (!%p3241_p2), %s2509_s16, 2048  }
 0x8ff   : > { %3635 = vsyncadd (!%p3241_p2), %s2509_s16, 4294965248  ;;  %p31_p8 = scmp.ge.s32.totalorder %s3940_s26, 4   ;;  %s4550_s18 = smov %s3642_s19 }
 0x900   : > { %s4551_s19 = smov %s3646_s20  ;;  %s4552_s20 = smov %s3951_s7 }
 0x901   : > { %s4553_s21 = smov %s3940_s26  ;;  %33 = sbr.rel (!%p31_p8) target bundleno = 18 (0x12), region = 157 }
 0x908   :  { %2514 = vsyncpa [#allocation3], 1 }
 0x909   :  { %2516 = vsyncpa [#allocation3 + $0x1], 1 }
 0x90a   :  { %2517 = vsyncpa [#allocation6], 1 }
 0x90b   :  { %2518 = vsyncpa [#allocation9], 1 }
 0x90c   :  { %2519 = vsyncpa [#allocation12], 1 }
 0x90d   :  { %2520 = vsyncpa [#allocation4], 1 }
 0x90e   :  { %2522 = vsyncpa [#allocation4 + $0x1], 1 }

</bundles_post_ra>
